<compile_context>
chip_gen: v7x
topology: tpu7x:2x2x1
jax: 0.10.0
libtpu: 0.0.40
codegen_flags: <defaults>
</compile_context>

<pallas_src>
import math
import functools

import jax
import jax.numpy as jnp
from jax import lax
from jax.experimental import pallas as pl
from jax.experimental.pallas import tpu as pltpu

PAD = 0
LN_EPS = 1e-5  # PyTorch nn.LayerNorm default


# ---------------------------------------------------------------------------
# Per-generation sizing helpers.
# ---------------------------------------------------------------------------
def _vmem_limit_bytes():
    cap = 64 * 1024 * 1024
    try:
        info = pltpu.get_tpu_info()
        cap = int(getattr(info, "vmem_capacity_bytes", cap) or cap)
    except Exception:
        pass
    # 3/4 of physical VMEM, clamped: ~96 MiB on 128-MiB parts (v5e/v6e),
    # ~48 MiB on 64-MiB parts (v7x).
    return max(32 * 1024 * 1024, min((cap * 3) // 4, 96 * 1024 * 1024))


def _pick_kv_tile(seq_len, cap=512):
    t = min(seq_len, cap)
    while seq_len % t:
        t -= 1
    return t


def _pick_encoder_rows(batch, seq_len, d_model, d_ff, kv_tile,
                       per_layer_w_bytes, budget):
    best = 1
    for bb in range(1, batch + 1):
        if batch % bb:
            continue
        r = bb * seq_len
        need = 2 * per_layer_w_bytes                 # double-buffered weights
        need += r * d_model * 4 * 6                  # x / h / residual / ctx (f32+bf16)
        need += r * 3 * d_model * 6                  # fused qkv (f32 + bf16 views)
        need += r * 2 * d_ff * 4                     # FFN hidden (f32)
        need += bb * seq_len * kv_tile * 4 * 3       # score / exp tiles per head
        need += seq_len * seq_len * 4                # causal-bias scratch
        if need <= budget:
            best = bb
    return best


def _pick_loss_tiles(batch, seq_len, d_model, vocab, budget):
    usable = int(budget * 0.7)
    bb = 1
    for cand in range(batch, 0, -1):
        if batch % cand:
            continue
        rows = cand * seq_len
        tv0 = min(vocab, 128)
        need = (rows * tv0 * 4 + rows * d_model * 6 +
                2 * (d_model * tv0 * 2 + tv0 * 4) + rows * 16)
        if need <= usable:
            bb = cand
            break
    rows = bb * seq_len
    tv = vocab
    for cand in (8192, 4096, 2048, 1024, 512, 256, 128):
        if vocab % cand:
            continue
        need = (rows * cand * 4 + rows * d_model * 6 +
                2 * (d_model * cand * 2 + cand * 4) + rows * 16)
        if need <= usable:
            tv = cand
            break
    return bb, tv


def _layer_norm(x, gamma, beta):
    mu = jnp.mean(x, axis=-1, keepdims=True)
    var = jnp.mean((x - mu) ** 2, axis=-1, keepdims=True)
    return (x - mu) * lax.rsqrt(var + LN_EPS) * gamma + beta


# ---------------------------------------------------------------------------
# Kernel 1: the whole encoder stack.  grid = (row_blocks, L); per-layer weights
# stacked with a leading L dim (streamed once per row block); the activation for
# the current row block lives in a VMEM scratch across all L layers.
# ---------------------------------------------------------------------------
def encoder_stack_kernel(x_ref,
                         wqkv_ref, bqkv_ref, wo_ref, bo_ref,
                         g1_ref, be1_ref,
                         w1_ref, b1_ref, w2_ref, b2_ref,
                         g2_ref, be2_ref,
                         o_ref, h_scr, bias_scr,
                         *, n_heads, rows, seq_len, kv_tile):
    l = pl.program_id(1)

    @pl.when(l == 0)
    def _():
        # bring this row block into the resident activation and build the causal
        # bias once per row block (not once per layer step).
        h_scr[...] = x_ref[...].astype(jnp.float32)
        r = lax.broadcasted_iota(jnp.int32, (seq_len, seq_len), 0)
        c = lax.broadcasted_iota(jnp.int32, (seq_len, seq_len), 1)
        bias_scr[...] = jnp.where(r >= c, 0.0, -1e9).astype(jnp.float32)

    x = h_scr[...]                                   # (R, D) f32, R = rows*seq_len
    R, D = x.shape
    dh = D // n_heads
    scale = 1.0 / math.sqrt(dh)

    # ---- fused QKV projection: one wide bf16 matmul, f32 accumulation ----
    xb = x.astype(jnp.bfloat16)
    qkv = jnp.dot(xb, wqkv_ref[0],
                  preferred_element_type=jnp.float32) + bqkv_ref[0]   # (R, 3D) f32

    # per-KV-tile causal bias slices, hoisted out of the head loop
    bias = bias_scr[...]
    n_kv = seq_len // kv_tile
    bias_t = [bias[:, j * kv_tile:(j + 1) * kv_tile][None] for j in range(n_kv)]

    # ---- attention: static head loop, flash-style online softmax over KV tiles
    ctx_parts = []
    for h in range(n_heads):
        lo = h * dh
        q_h = qkv[:, lo:lo + dh].reshape(rows, seq_len, dh).astype(jnp.bfloat16)
        k_h = qkv[:, D + lo:D + lo + dh].reshape(rows, seq_len, dh).astype(jnp.bfloat16)
        v_h = qkv[:, 2 * D + lo:2 * D + lo + dh].reshape(rows, seq_len, dh
                                                         ).astype(jnp.bfloat16)
        m = jnp.full((rows, seq_len, 1), -1e30, jnp.float32)
        lse = jnp.zeros((rows, seq_len, 1), jnp.float32)
        acc = jnp.zeros((rows, seq_len, dh), jnp.float32)
        for j in range(n_kv):
            k_t = k_h[:, j * kv_tile:(j + 1) * kv_tile, :]
            v_t = v_h[:, j * kv_tile:(j + 1) * kv_tile, :]
            s = jnp.einsum('bqd,bkd->bqk', q_h, k_t,
                           preferred_element_type=jnp.float32) * scale + bias_t[j]
            m_new = jnp.maximum(m, jnp.max(s, axis=-1, keepdims=True))
            alpha = jnp.exp(m - m_new)
            p = jnp.exp(s - m_new)
            lse = alpha * lse + jnp.sum(p, axis=-1, keepdims=True)
            acc = alpha * acc + jnp.einsum('bqk,bkd->bqd', p.astype(jnp.bfloat16),
                                           v_t, preferred_element_type=jnp.float32)
            m = m_new
        # exact reciprocal for numerical parity with PyTorch softmax
        ctx_h = acc * pl.reciprocal(lse, approx=False)           # (rows, T, dh) f32
        ctx_parts.append(ctx_h.reshape(R, dh))
    ctx = jnp.concatenate(ctx_parts, axis=-1)                    # (R, D) f32

    # single full-width output projection
    attn_out = jnp.dot(ctx.astype(jnp.bfloat16), wo_ref[0],
                       preferred_element_type=jnp.float32) + bo_ref[0]

    # post-norm residual 1 (residual_dropout treated as 0.0 -> no-op)
    h1 = _layer_norm(x + attn_out, g1_ref[0], be1_ref[0])

    # position-wise FFN with GLU activation: D -> 2F, glu, F -> D
    ff = jnp.dot(h1.astype(jnp.bfloat16), w1_ref[0],
                 preferred_element_type=jnp.float32) + b1_ref[0]       # (R, 2F)
    F2 = ff.shape[-1] // 2
    glu = ff[:, :F2] * jax.nn.sigmoid(ff[:, F2:])
    ff_out = jnp.dot(glu.astype(jnp.bfloat16), w2_ref[0],
                     preferred_element_type=jnp.float32) + b2_ref[0]

    # post-norm residual 2; carry the activation in VMEM to the next layer
    out = _layer_norm(h1 + ff_out, g2_ref[0], be2_ref[0])
    h_scr[...] = out

    @pl.when(l == pl.num_programs(1) - 1)
    def _():
        o_ref[...] = out.astype(o_ref.dtype)


def run_encoder_stack(x_flat, params, n_heads, batch, seq_len):
    R, D = x_flat.shape
    names = ["wqkv", "bqkv", "wo", "bo", "g1", "be1",
             "w1", "b1", "w2", "b2", "g2", "be2"]
    weights = [params[n] for n in names]
    L = weights[0].shape[0]
    d_ff = params["w2"].shape[1]

    vmem_limit = _vmem_limit_bytes()
    kv_tile = _pick_kv_tile(seq_len)
    per_layer_w = sum(math.prod(w.shape[1:]) * w.dtype.itemsize for w in weights)
    bb = _pick_encoder_rows(batch, seq_len, D, d_ff, kv_tile, per_layer_w,
                            vmem_limit)
    rb = bb * seq_len
    n_rb = batch // bb

    w_specs = [pl.BlockSpec((1,) + w.shape[1:], lambda b, l: (l, 0, 0))
               for w in weights]
    return pl.pallas_call(
        functools.partial(encoder_stack_kernel, n_heads=n_heads, rows=bb,
                          seq_len=seq_len, kv_tile=kv_tile),
        out_shape=jax.ShapeDtypeStruct((R, D), jnp.float32),
        grid=(n_rb, L),
        in_specs=[pl.BlockSpec((rb, D), lambda b, l: (b, 0))] + w_specs,
        out_specs=pl.BlockSpec((rb, D), lambda b, l: (b, 0)),
        scratch_shapes=[pltpu.VMEM((rb, D), jnp.float32),
                        pltpu.VMEM((seq_len, seq_len), jnp.float32)],
        compiler_params=pltpu.CompilerParams(
            dimension_semantics=("parallel", "arbitrary"),
            vmem_limit_bytes=vmem_limit),
    )(x_flat, *weights)


# ---------------------------------------------------------------------------
# Kernel 2: output projection + label-smoothing loss, vocab-tiled with online
# logsumexp and a closed-form KL reduction.  grid = (row_blocks, V // TV);
# all rows of a block share each streamed (D, TV) weight tile.
# ---------------------------------------------------------------------------
def logits_loss_kernel(x_ref, tgt_ref, w_ref, b_ref, o_ref,
                       m_scr, l_scr, t_scr, s_scr,
                       *, smoothing, vocab_size, tile_v):
    v_idx = pl.program_id(1)

    @pl.when(v_idx == 0)
    def _():
        m_scr[...] = jnp.full_like(m_scr, -1e30)
        l_scr[...] = jnp.zeros_like(l_scr)
        t_scr[...] = jnp.zeros_like(t_scr)
        s_scr[...] = jnp.zeros_like(s_scr)

    xb = x_ref[...].astype(jnp.bfloat16)                       # (R, D)
    tgt = tgt_ref[...]                                         # (R, 1) int32
    logits = jnp.dot(xb, w_ref[...],
                     preferred_element_type=jnp.float32) + b_ref[...]   # (R, TV) f32

    # online max / sum-exp across vocab tiles
    m_prev = m_scr[...]
    m_new = jnp.maximum(m_prev, jnp.max(logits, axis=-1, keepdims=True))
    l_scr[...] = (l_scr[...] * jnp.exp(m_prev - m_new) +
                  jnp.sum(jnp.exp(logits - m_new), axis=-1, keepdims=True))
    m_scr[...] = m_new
    # running sum of logits over the vocab (for sum_v log_softmax[v])
    s_scr[...] = s_scr[...] + jnp.sum(logits, axis=-1, keepdims=True)
    # target-logit gather: one (1, TV) lane iota vs (tgt - tile offset)
    lane = lax.broadcasted_iota(jnp.int32, (1, tile_v), 1)
    hit = lane == (tgt - v_idx * tile_v)
    t_scr[...] = t_scr[...] + jnp.sum(jnp.where(hit, logits, 0.0),
                                      axis=-1, keepdims=True)

    @pl.when(v_idx == pl.num_programs(1) - 1)
    def _():
        lse = m_scr[...] + jnp.log(l_scr[...])                    # (R, 1)
        logp_t = t_scr[...] - lse                                 # log_softmax at target
        sum_logp = s_scr[...] - float(vocab_size) * lse           # sum_v log_softmax[v]
        conf = 1.0 - smoothing
        smooth_val = smoothing / (vocab_size - 1)
        neg_ent = conf * math.log(conf) if conf > 0.0 else 0.0
        if smoothing > 0.0:
            neg_ent += (vocab_size - 1) * smooth_val * math.log(smooth_val)
        # KL(true_dist || softmax) per token, closed form (espnet-style smoothing)
        # TODO(synk): if the reference LabelSmoothingLoss zeroes the PAD column
        # (Annotated-Transformer variant) adjust smooth_val / neg_ent accordingly.
        per_tok = neg_ent - (conf * logp_t + smooth_val * (sum_logp - logp_t))
        per_tok = jnp.where(tgt == PAD, 0.0, per_tok)
        o_ref[0] = jnp.sum(per_tok, axis=0, keepdims=True)        # (1, 1)


def run_logits_loss(x_flat, tgt_flat, w_out, b_out, smoothing, batch, seq_len):
    R, D = x_flat.shape
    V = w_out.shape[1]
    budget = _vmem_limit_bytes()
    bb, tv = _pick_loss_tiles(batch, seq_len, D, V, budget)
    rb = bb * seq_len
    n_rb = batch // bb
    per_block = pl.pallas_call(
        functools.partial(logits_loss_kernel, smoothing=smoothing,
                          vocab_size=V, tile_v=tv),
        out_shape=jax.ShapeDtypeStruct((n_rb, 1, 1), jnp.float32),
        grid=(n_rb, V // tv),
        in_specs=[pl.BlockSpec((rb, D), lambda b, v: (b, 0)),
                  pl.BlockSpec((rb, 1), lambda b, v: (b, 0)),
                  pl.BlockSpec((D, tv), lambda b, v: (0, v)),
                  pl.BlockSpec((1, tv), lambda b, v: (0, v))],
        out_specs=pl.BlockSpec((1, 1, 1), lambda b, v: (b, 0, 0)),
        scratch_shapes=[pltpu.VMEM((rb, 1), jnp.float32)] * 4,
        compiler_params=pltpu.CompilerParams(
            dimension_semantics=("parallel", "arbitrary"),
            vmem_limit_bytes=budget),
    )(x_flat, tgt_flat, w_out, b_out)
    return per_block                                  # (n_rb, 1, 1) loss sums


# ---------------------------------------------------------------------------
# Glue: parameters, positional encoding, full forward.
# ---------------------------------------------------------------------------
def sinusoidal_pe(max_len, d_model):
    pos = jnp.arange(max_len, dtype=jnp.float32)[:, None]
    div = jnp.exp(jnp.arange(0, d_model, 2, dtype=jnp.float32) *
                  (-math.log(10000.0) / d_model))
    pe = jnp.zeros((max_len, d_model), jnp.float32)
    pe = pe.at[:, 0::2].set(jnp.sin(pos * div))
    pe = pe.at[:, 1::2].set(jnp.cos(pos * div))
    return pe


def init_params(key, vocab_size, d_model, n_heads, d_ff, num_blocks):
    def dense(k, fan_in, fan_out):
        return (jax.random.normal(k, (fan_in, fan_out), jnp.float32) * 0.02
                ).astype(jnp.bfloat16)

    keys = jax.random.split(key, 2 + 4 * num_blocks)
    params = {
        "embedding": jax.random.normal(keys[0], (vocab_size, d_model),
                                       jnp.float32) * 0.02,
        "out_w": dense(keys[1], d_model, vocab_size),
        "out_b": jnp.zeros((1, vocab_size), jnp.float32),
    }
    wqkv, wo, w1, w2 = [], [], [], []
    ki = 2
    for _ in range(num_blocks):
        ks = keys[ki:ki + 4]
        ki += 4
        wqkv.append(dense(ks[0], d_model, 3 * d_model))   # fused Wq|Wk|Wv
        wo.append(dense(ks[1], d_model, d_model))
        w1.append(dense(ks[2], d_model, 2 * d_ff))
        w2.append(dense(ks[3], d_ff, d_model))
    L = num_blocks
    params.update({
        "wqkv": jnp.stack(wqkv), "bqkv": jnp.zeros((L, 1, 3 * d_model), jnp.float32),
        "wo": jnp.stack(wo),     "bo":   jnp.zeros((L, 1, d_model), jnp.float32),
        "g1": jnp.ones((L, 1, d_model), jnp.float32),
        "be1": jnp.zeros((L, 1, d_model), jnp.float32),
        "w1": jnp.stack(w1),     "b1":   jnp.zeros((L, 1, 2 * d_ff), jnp.float32),
        "w2": jnp.stack(w2),     "b2":   jnp.zeros((L, 1, d_model), jnp.float32),
        "g2": jnp.ones((L, 1, d_model), jnp.float32),
        "be2": jnp.zeros((L, 1, d_model), jnp.float32),
    })
    return params


def rbt_air_lm_forward(params, inputs, targets, *, n_heads, smoothing):
    """Returns (loss, None) like the PyTorch module."""
    B, T = inputs.shape
    D = params["embedding"].shape[1]
    # pad T to a sublane multiple; padded positions are appended at the end so the
    # causal mask prevents real queries from seeing them and their PAD targets are
    # ignored by the loss -> semantics unchanged.
    T_pad = ((T + 7) // 8) * 8
    if T_pad != T:
        inputs = jnp.pad(inputs, ((0, 0), (0, T_pad - T)), constant_values=PAD)
        targets = jnp.pad(targets, ((0, 0), (0, T_pad - T)), constant_values=PAD)

    # embedding + positional encoding (glue; x*sqrt(D) + pe, dropout=0)
    x = params["embedding"][inputs] * math.sqrt(D) + sinusoidal_pe(T_pad, D)[None]
    x_flat = x.reshape(B * T_pad, D).astype(jnp.float32)

    # all transformer blocks in one fused Pallas kernel (activations VMEM-resident)
    h = run_encoder_stack(x_flat, params, n_heads, B, T_pad)

    # output projection + label-smoothing KL loss (vocab-tiled Pallas kernel)
    tgt_flat = targets.reshape(B * T_pad, 1).astype(jnp.int32)
    per_block = run_logits_loss(h, tgt_flat, params["out_w"], params["out_b"],
                                smoothing, B, T_pad)
    # TODO(synk): espnet-style LabelSmoothingLoss may normalize by batch size instead
    # of valid-token count depending on normalize_length; valid-token count used here.
    n_valid = jnp.sum((targets != PAD).astype(jnp.float32))
    loss = jnp.sum(per_block) / jnp.maximum(n_valid, 1.0)
    return loss, None


if __name__ == "__main__":
    B, T = 2, 8
    D_MODEL, N_HEADS, D_FF = 32, 4, 64
    VOCAB, N_BLOCKS, SMOOTHING = 128, 2, 0.1

    key = jax.random.PRNGKey(0)
    kp, ki, kt = jax.random.split(key, 3)
    params = init_params(kp, VOCAB, D_MODEL, N_HEADS, D_FF, N_BLOCKS)

    inputs = jax.random.randint(ki, (B, T), 1, VOCAB, dtype=jnp.int32)
    targets = jax.random.randint(kt, (B, T), 1, VOCAB, dtype=jnp.int32)
    targets = targets.at[:, -2:].set(PAD)   # some padding to exercise the mask

    loss, _ = rbt_air_lm_forward(params, inputs, targets,
                                 n_heads=N_HEADS, smoothing=SMOOTHING)
    jax.block_until_ready(loss)
    assert jnp.isfinite(loss)
    print("KERNEL_OK")
</pallas_src>

<mosaic_0001>
module attributes {stable_mosaic.version = 11 : i64} {
  func.func @encoder_stack_kernel(%arg0: i32, %arg1: i32, %arg2: memref<16x32xf32, #tpu.memory_space<vmem>>, %arg3: memref<1x32x96xbf16, #tpu.memory_space<vmem>>, %arg4: memref<1x1x96xf32, #tpu.memory_space<vmem>>, %arg5: memref<1x32x32xbf16, #tpu.memory_space<vmem>>, %arg6: memref<1x1x32xf32, #tpu.memory_space<vmem>>, %arg7: memref<1x1x32xf32, #tpu.memory_space<vmem>>, %arg8: memref<1x1x32xf32, #tpu.memory_space<vmem>>, %arg9: memref<1x32x128xbf16, #tpu.memory_space<vmem>>, %arg10: memref<1x1x128xf32, #tpu.memory_space<vmem>>, %arg11: memref<1x64x32xbf16, #tpu.memory_space<vmem>>, %arg12: memref<1x1x32xf32, #tpu.memory_space<vmem>>, %arg13: memref<1x1x32xf32, #tpu.memory_space<vmem>>, %arg14: memref<1x1x32xf32, #tpu.memory_space<vmem>>, %arg15: memref<16x32xf32, #tpu.memory_space<vmem>>, %arg16: memref<16x32xf32, #tpu.memory_space<vmem>>, %arg17: memref<8x8xf32, #tpu.memory_space<vmem>>) attributes {dimension_semantics = [#tpu.dimension_semantics<parallel>, #tpu.dimension_semantics<arbitrary>], iteration_bounds = array<i64: 1, 2>, scalar_prefetch = 0 : i64, scratch_operands = 2 : i64, tpu.core_type = #tpu.core_type<tc>, window_params = [{transform_indices = @transform_0, window_bounds = array<i64: 16, 32>}, {transform_indices = @transform_1, window_bounds = array<i64: 1, 32, 96>}, {transform_indices = @transform_2, window_bounds = array<i64: 1, 1, 96>}, {transform_indices = @transform_3, window_bounds = array<i64: 1, 32, 32>}, {transform_indices = @transform_4, window_bounds = array<i64: 1, 1, 32>}, {transform_indices = @transform_5, window_bounds = array<i64: 1, 1, 32>}, {transform_indices = @transform_6, window_bounds = array<i64: 1, 1, 32>}, {transform_indices = @transform_7, window_bounds = array<i64: 1, 32, 128>}, {transform_indices = @transform_8, window_bounds = array<i64: 1, 1, 128>}, {transform_indices = @transform_9, window_bounds = array<i64: 1, 64, 32>}, {transform_indices = @transform_10, window_bounds = array<i64: 1, 1, 32>}, {transform_indices = @transform_11, window_bounds = array<i64: 1, 1, 32>}, {transform_indices = @transform_12, window_bounds = array<i64: 1, 1, 32>}, {transform_indices = @transform_13, window_bounds = array<i64: 16, 32>}]} {
    %c0_i32 = arith.constant 0 : i32
    %0 = arith.cmpi eq, %arg1, %c0_i32 : i32
    %1 = arith.extui %0 : i1 to i32
    %c0_i32_0 = arith.constant 0 : i32
    %2 = arith.cmpi ne, %1, %c0_i32_0 : i32
    scf.if %2 {
      %c0_89 = arith.constant 0 : index
      %c0_90 = arith.constant 0 : index
      %257 = vector.load %arg2[%c0_89, %c0_90] : memref<16x32xf32, #tpu.memory_space<vmem>>, vector<16x32xf32>
      %c0_91 = arith.constant 0 : index
      %c0_92 = arith.constant 0 : index
      %258 = vector.load %arg16[%c0_91, %c0_92] : memref<16x32xf32, #tpu.memory_space<vmem>>, vector<16x32xf32>
      tpu.vector_store %arg16[%c0_91, %c0_92], %257 {strides = array<i32>} : memref<16x32xf32, #tpu.memory_space<vmem>>, vector<16x32xf32>,
      %259 = tpu.iota {dimensions = array<i32: 0>} : vector<8x8xi32>
      %260 = tpu.iota {dimensions = array<i32: 1>} : vector<8x8xi32>
      %261 = arith.cmpi sge, %259, %260 : vector<8x8xi32>
      %cst_93 = arith.constant 0.000000e+00 : f32
      %cst_94 = arith.constant -1.000000e+09 : f32
      %262 = vector.broadcast %cst_93 : f32 to vector<8x8xf32>
      %263 = vector.broadcast %cst_94 : f32 to vector<8x8xf32>
      %264 = arith.select %261, %262, %263 : vector<8x8xi1>, vector<8x8xf32>
      %c0_95 = arith.constant 0 : index
      %c0_96 = arith.constant 0 : index
      %265 = vector.load %arg17[%c0_95, %c0_96] : memref<8x8xf32, #tpu.memory_space<vmem>>, vector<8x8xf32>
      tpu.vector_store %arg17[%c0_95, %c0_96], %264 {strides = array<i32>} : memref<8x8xf32, #tpu.memory_space<vmem>>, vector<8x8xf32>,
    } else {
    }
    %c0 = arith.constant 0 : index
    %c0_1 = arith.constant 0 : index
    %3 = vector.load %arg16[%c0, %c0_1] : memref<16x32xf32, #tpu.memory_space<vmem>>, vector<16x32xf32>
    %4 = arith.truncf %3 : vector<16x32xf32> to vector<16x32xbf16>
    %c0_2 = arith.constant 0 : index
    %c0_3 = arith.constant 0 : index
    %c0_4 = arith.constant 0 : index
    %5 = vector.load %arg3[%c0_2, %c0_3, %c0_4] : memref<1x32x96xbf16, #tpu.memory_space<vmem>>, vector<1x32x96xbf16>
    %6 = vector.shape_cast %5 : vector<1x32x96xbf16> to vector<32x96xbf16>
    %cst = arith.constant dense<0.000000e+00> : vector<16x96xf32>
    %7 = tpu.matmul %4, %6, %cst {dimension_numbers = #tpu.dot_dimension_numbers<[1], [0], [0], [1], [0, 0, 1, 1], [], []>} : vector<16x32xbf16>, vector<32x96xbf16>, vector<16x96xf32> -> vector<16x96xf32>
    %c0_5 = arith.constant 0 : index
    %c0_6 = arith.constant 0 : index
    %c0_7 = arith.constant 0 : index
    %8 = vector.load %arg4[%c0_5, %c0_6, %c0_7] : memref<1x1x96xf32, #tpu.memory_space<vmem>>, vector<1x1x96xf32>
    %9 = vector.shape_cast %8 : vector<1x1x96xf32> to vector<1x96xf32>
    %10 = vector.broadcast %9 : vector<1x96xf32> to vector<16x96xf32>
    %11 = arith.addf %7, %10 : vector<16x96xf32>
    %c0_8 = arith.constant 0 : index
    %c0_9 = arith.constant 0 : index
    %12 = vector.load %arg17[%c0_8, %c0_9] : memref<8x8xf32, #tpu.memory_space<vmem>>, vector<8x8xf32>
    %13 = vector.shape_cast %12 : vector<8x8xf32> to vector<1x8x8xf32>
    %14 = vector.extract_strided_slice %11 {offsets = [0, 0], sizes = [16, 8], strides = [1, 1]} : vector<16x96xf32> to vector<16x8xf32>
    %15 = vector.shape_cast %14 : vector<16x8xf32> to vector<2x8x8xf32>
    %16 = arith.truncf %15 : vector<2x8x8xf32> to vector<2x8x8xbf16>
    %17 = vector.extract_strided_slice %11 {offsets = [0, 32], sizes = [16, 8], strides = [1, 1]} : vector<16x96xf32> to vector<16x8xf32>
    %18 = vector.shape_cast %17 : vector<16x8xf32> to vector<2x8x8xf32>
    %19 = arith.truncf %18 : vector<2x8x8xf32> to vector<2x8x8xbf16>
    %20 = vector.extract_strided_slice %11 {offsets = [0, 64], sizes = [16, 8], strides = [1, 1]} : vector<16x96xf32> to vector<16x8xf32>
    %21 = vector.shape_cast %20 : vector<16x8xf32> to vector<2x8x8xf32>
    %22 = arith.truncf %21 : vector<2x8x8xf32> to vector<2x8x8xbf16>
    %cst_10 = arith.constant -1.000000e+30 : f32
    %23 = vector.broadcast %cst_10 : f32 to vector<2x8x1xf32>
    %cst_11 = arith.constant 0.000000e+00 : f32
    %24 = vector.broadcast %cst_11 : f32 to vector<2x8x1xf32>
    %cst_12 = arith.constant 0.000000e+00 : f32
    %25 = vector.broadcast %cst_12 : f32 to vector<2x8x8xf32>
    "tpu.trace_start"() <{level = 10 : i32, message = "bqd,bkd->bqk"}> : () -> ()
    %cst_13 = arith.constant dense<0.000000e+00> : vector<2x8x8xf32>
    %26 = tpu.matmul %16, %19, %cst_13 {dimension_numbers = #tpu.dot_dimension_numbers<[2], [2], [1], [1], [0, 0, 0, 1, 1, 1], [0], [0]>} : vector<2x8x8xbf16>, vector<2x8x8xbf16>, vector<2x8x8xf32> -> vector<2x8x8xf32>
    "tpu.trace_stop"() : () -> ()
    %cst_14 = arith.constant 0.353553385 : f32
    %27 = vector.broadcast %cst_14 : f32 to vector<2x8x8xf32>
    %28 = arith.mulf %26, %27 : vector<2x8x8xf32>
    %29 = vector.broadcast %13 : vector<1x8x8xf32> to vector<2x8x8xf32>
    %30 = arith.addf %28, %29 : vector<2x8x8xf32>
    %cst_15 = arith.constant dense<0xFF800000> : vector<2x8xf32>
    %31 = vector.multi_reduction <maximumf>, %30, %cst_15 [2] : vector<2x8x8xf32> to vector<2x8xf32>
    %32 = vector.shape_cast %31 : vector<2x8xf32> to vector<2x8x1xf32>
    %33 = arith.maximumf %23, %32 : vector<2x8x1xf32>
    %34 = arith.subf %23, %33 : vector<2x8x1xf32>
    %35 = math.exp %34 : vector<2x8x1xf32>
    %36 = vector.broadcast %33 : vector<2x8x1xf32> to vector<2x8x8xf32>
    %37 = arith.subf %30, %36 : vector<2x8x8xf32>
    %38 = math.exp %37 : vector<2x8x8xf32>
    %39 = arith.mulf %35, %24 : vector<2x8x1xf32>
    %cst_16 = arith.constant dense<0.000000e+00> : vector<2x8xf32>
    %40 = vector.multi_reduction <add>, %38, %cst_16 [2] : vector<2x8x8xf32> to vector<2x8xf32>
    %41 = vector.shape_cast %40 : vector<2x8xf32> to vector<2x8x1xf32>
    %42 = arith.addf %39, %41 : vector<2x8x1xf32>
    %43 = vector.broadcast %35 : vector<2x8x1xf32> to vector<2x8x8xf32>
    %44 = arith.mulf %43, %25 : vector<2x8x8xf32>
    %45 = arith.truncf %38 : vector<2x8x8xf32> to vector<2x8x8xbf16>
    "tpu.trace_start"() <{level = 10 : i32, message = "bqk,bkd->bqd"}> : () -> ()
    %cst_17 = arith.constant dense<0.000000e+00> : vector<2x8x8xf32>
    %46 = tpu.matmul %45, %22, %cst_17 {dimension_numbers = #tpu.dot_dimension_numbers<[2], [1], [1], [2], [0, 0, 0, 1, 1, 2], [0], [0]>} : vector<2x8x8xbf16>, vector<2x8x8xbf16>, vector<2x8x8xf32> -> vector<2x8x8xf32>
    "tpu.trace_stop"() : () -> ()
    %47 = arith.addf %44, %46 : vector<2x8x8xf32>
    %48 = tpu.reciprocal %42 : vector<2x8x1xf32> -> vector<2x8x1xf32>
    %49 = vector.broadcast %48 : vector<2x8x1xf32> to vector<2x8x8xf32>
    %50 = arith.mulf %47, %49 : vector<2x8x8xf32>
    %51 = vector.shape_cast %50 : vector<2x8x8xf32> to vector<16x8xf32>
    %52 = vector.extract_strided_slice %11 {offsets = [0, 8], sizes = [16, 8], strides = [1, 1]} : vector<16x96xf32> to vector<16x8xf32>
    %53 = vector.shape_cast %52 : vector<16x8xf32> to vector<2x8x8xf32>
    %54 = arith.truncf %53 : vector<2x8x8xf32> to vector<2x8x8xbf16>
    %55 = vector.extract_strided_slice %11 {offsets = [0, 40], sizes = [16, 8], strides = [1, 1]} : vector<16x96xf32> to vector<16x8xf32>
    %56 = vector.shape_cast %55 : vector<16x8xf32> to vector<2x8x8xf32>
    %57 = arith.truncf %56 : vector<2x8x8xf32> to vector<2x8x8xbf16>
    %58 = vector.extract_strided_slice %11 {offsets = [0, 72], sizes = [16, 8], strides = [1, 1]} : vector<16x96xf32> to vector<16x8xf32>
    %59 = vector.shape_cast %58 : vector<16x8xf32> to vector<2x8x8xf32>
    %60 = arith.truncf %59 : vector<2x8x8xf32> to vector<2x8x8xbf16>
    %cst_18 = arith.constant -1.000000e+30 : f32
    %61 = vector.broadcast %cst_18 : f32 to vector<2x8x1xf32>
    %cst_19 = arith.constant 0.000000e+00 : f32
    %62 = vector.broadcast %cst_19 : f32 to vector<2x8x1xf32>
    %cst_20 = arith.constant 0.000000e+00 : f32
    %63 = vector.broadcast %cst_20 : f32 to vector<2x8x8xf32>
    "tpu.trace_start"() <{level = 10 : i32, message = "bqd,bkd->bqk"}> : () -> ()
    %cst_21 = arith.constant dense<0.000000e+00> : vector<2x8x8xf32>
    %64 = tpu.matmul %54, %57, %cst_21 {dimension_numbers = #tpu.dot_dimension_numbers<[2], [2], [1], [1], [0, 0, 0, 1, 1, 1], [0], [0]>} : vector<2x8x8xbf16>, vector<2x8x8xbf16>, vector<2x8x8xf32> -> vector<2x8x8xf32>
    "tpu.trace_stop"() : () -> ()
    %cst_22 = arith.constant 0.353553385 : f32
    %65 = vector.broadcast %cst_22 : f32 to vector<2x8x8xf32>
    %66 = arith.mulf %64, %65 : vector<2x8x8xf32>
    %67 = vector.broadcast %13 : vector<1x8x8xf32> to vector<2x8x8xf32>
    %68 = arith.addf %66, %67 : vector<2x8x8xf32>
    %cst_23 = arith.constant dense<0xFF800000> : vector<2x8xf32>
    %69 = vector.multi_reduction <maximumf>, %68, %cst_23 [2] : vector<2x8x8xf32> to vector<2x8xf32>
    %70 = vector.shape_cast %69 : vector<2x8xf32> to vector<2x8x1xf32>
    %71 = arith.maximumf %61, %70 : vector<2x8x1xf32>
    %72 = arith.subf %61, %71 : vector<2x8x1xf32>
    %73 = math.exp %72 : vector<2x8x1xf32>
    %74 = vector.broadcast %71 : vector<2x8x1xf32> to vector<2x8x8xf32>
    %75 = arith.subf %68, %74 : vector<2x8x8xf32>
    %76 = math.exp %75 : vector<2x8x8xf32>
    %77 = arith.mulf %73, %62 : vector<2x8x1xf32>
    %cst_24 = arith.constant dense<0.000000e+00> : vector<2x8xf32>
    %78 = vector.multi_reduction <add>, %76, %cst_24 [2] : vector<2x8x8xf32> to vector<2x8xf32>
    %79 = vector.shape_cast %78 : vector<2x8xf32> to vector<2x8x1xf32>
    %80 = arith.addf %77, %79 : vector<2x8x1xf32>
    %81 = vector.broadcast %73 : vector<2x8x1xf32> to vector<2x8x8xf32>
    %82 = arith.mulf %81, %63 : vector<2x8x8xf32>
    %83 = arith.truncf %76 : vector<2x8x8xf32> to vector<2x8x8xbf16>
    "tpu.trace_start"() <{level = 10 : i32, message = "bqk,bkd->bqd"}> : () -> ()
    %cst_25 = arith.constant dense<0.000000e+00> : vector<2x8x8xf32>
    %84 = tpu.matmul %83, %60, %cst_25 {dimension_numbers = #tpu.dot_dimension_numbers<[2], [1], [1], [2], [0, 0, 0, 1, 1, 2], [0], [0]>} : vector<2x8x8xbf16>, vector<2x8x8xbf16>, vector<2x8x8xf32> -> vector<2x8x8xf32>
    "tpu.trace_stop"() : () -> ()
    %85 = arith.addf %82, %84 : vector<2x8x8xf32>
    %86 = tpu.reciprocal %80 : vector<2x8x1xf32> -> vector<2x8x1xf32>
    %87 = vector.broadcast %86 : vector<2x8x1xf32> to vector<2x8x8xf32>
    %88 = arith.mulf %85, %87 : vector<2x8x8xf32>
    %89 = vector.shape_cast %88 : vector<2x8x8xf32> to vector<16x8xf32>
    %90 = vector.extract_strided_slice %11 {offsets = [0, 16], sizes = [16, 8], strides = [1, 1]} : vector<16x96xf32> to vector<16x8xf32>
    %91 = vector.shape_cast %90 : vector<16x8xf32> to vector<2x8x8xf32>
    %92 = arith.truncf %91 : vector<2x8x8xf32> to vector<2x8x8xbf16>
    %93 = vector.extract_strided_slice %11 {offsets = [0, 48], sizes = [16, 8], strides = [1, 1]} : vector<16x96xf32> to vector<16x8xf32>
    %94 = vector.shape_cast %93 : vector<16x8xf32> to vector<2x8x8xf32>
    %95 = arith.truncf %94 : vector<2x8x8xf32> to vector<2x8x8xbf16>
    %96 = vector.extract_strided_slice %11 {offsets = [0, 80], sizes = [16, 8], strides = [1, 1]} : vector<16x96xf32> to vector<16x8xf32>
    %97 = vector.shape_cast %96 : vector<16x8xf32> to vector<2x8x8xf32>
    %98 = arith.truncf %97 : vector<2x8x8xf32> to vector<2x8x8xbf16>
    %cst_26 = arith.constant -1.000000e+30 : f32
    %99 = vector.broadcast %cst_26 : f32 to vector<2x8x1xf32>
    %cst_27 = arith.constant 0.000000e+00 : f32
    %100 = vector.broadcast %cst_27 : f32 to vector<2x8x1xf32>
    %cst_28 = arith.constant 0.000000e+00 : f32
    %101 = vector.broadcast %cst_28 : f32 to vector<2x8x8xf32>
    "tpu.trace_start"() <{level = 10 : i32, message = "bqd,bkd->bqk"}> : () -> ()
    %cst_29 = arith.constant dense<0.000000e+00> : vector<2x8x8xf32>
    %102 = tpu.matmul %92, %95, %cst_29 {dimension_numbers = #tpu.dot_dimension_numbers<[2], [2], [1], [1], [0, 0, 0, 1, 1, 1], [0], [0]>} : vector<2x8x8xbf16>, vector<2x8x8xbf16>, vector<2x8x8xf32> -> vector<2x8x8xf32>
    "tpu.trace_stop"() : () -> ()
    %cst_30 = arith.constant 0.353553385 : f32
    %103 = vector.broadcast %cst_30 : f32 to vector<2x8x8xf32>
    %104 = arith.mulf %102, %103 : vector<2x8x8xf32>
    %105 = vector.broadcast %13 : vector<1x8x8xf32> to vector<2x8x8xf32>
    %106 = arith.addf %104, %105 : vector<2x8x8xf32>
    %cst_31 = arith.constant dense<0xFF800000> : vector<2x8xf32>
    %107 = vector.multi_reduction <maximumf>, %106, %cst_31 [2] : vector<2x8x8xf32> to vector<2x8xf32>
    %108 = vector.shape_cast %107 : vector<2x8xf32> to vector<2x8x1xf32>
    %109 = arith.maximumf %99, %108 : vector<2x8x1xf32>
    %110 = arith.subf %99, %109 : vector<2x8x1xf32>
    %111 = math.exp %110 : vector<2x8x1xf32>
    %112 = vector.broadcast %109 : vector<2x8x1xf32> to vector<2x8x8xf32>
    %113 = arith.subf %106, %112 : vector<2x8x8xf32>
    %114 = math.exp %113 : vector<2x8x8xf32>
    %115 = arith.mulf %111, %100 : vector<2x8x1xf32>
    %cst_32 = arith.constant dense<0.000000e+00> : vector<2x8xf32>
    %116 = vector.multi_reduction <add>, %114, %cst_32 [2] : vector<2x8x8xf32> to vector<2x8xf32>
    %117 = vector.shape_cast %116 : vector<2x8xf32> to vector<2x8x1xf32>
    %118 = arith.addf %115, %117 : vector<2x8x1xf32>
    %119 = vector.broadcast %111 : vector<2x8x1xf32> to vector<2x8x8xf32>
    %120 = arith.mulf %119, %101 : vector<2x8x8xf32>
    %121 = arith.truncf %114 : vector<2x8x8xf32> to vector<2x8x8xbf16>
    "tpu.trace_start"() <{level = 10 : i32, message = "bqk,bkd->bqd"}> : () -> ()
    %cst_33 = arith.constant dense<0.000000e+00> : vector<2x8x8xf32>
    %122 = tpu.matmul %121, %98, %cst_33 {dimension_numbers = #tpu.dot_dimension_numbers<[2], [1], [1], [2], [0, 0, 0, 1, 1, 2], [0], [0]>} : vector<2x8x8xbf16>, vector<2x8x8xbf16>, vector<2x8x8xf32> -> vector<2x8x8xf32>
    "tpu.trace_stop"() : () -> ()
    %123 = arith.addf %120, %122 : vector<2x8x8xf32>
    %124 = tpu.reciprocal %118 : vector<2x8x1xf32> -> vector<2x8x1xf32>
    %125 = vector.broadcast %124 : vector<2x8x1xf32> to vector<2x8x8xf32>
    %126 = arith.mulf %123, %125 : vector<2x8x8xf32>
    %127 = vector.shape_cast %126 : vector<2x8x8xf32> to vector<16x8xf32>
    %128 = vector.extract_strided_slice %11 {offsets = [0, 24], sizes = [16, 8], strides = [1, 1]} : vector<16x96xf32> to vector<16x8xf32>
    %129 = vector.shape_cast %128 : vector<16x8xf32> to vector<2x8x8xf32>
    %130 = arith.truncf %129 : vector<2x8x8xf32> to vector<2x8x8xbf16>
    %131 = vector.extract_strided_slice %11 {offsets = [0, 56], sizes = [16, 8], strides = [1, 1]} : vector<16x96xf32> to vector<16x8xf32>
    %132 = vector.shape_cast %131 : vector<16x8xf32> to vector<2x8x8xf32>
    %133 = arith.truncf %132 : vector<2x8x8xf32> to vector<2x8x8xbf16>
    %134 = vector.extract_strided_slice %11 {offsets = [0, 88], sizes = [16, 8], strides = [1, 1]} : vector<16x96xf32> to vector<16x8xf32>
    %135 = vector.shape_cast %134 : vector<16x8xf32> to vector<2x8x8xf32>
    %136 = arith.truncf %135 : vector<2x8x8xf32> to vector<2x8x8xbf16>
    %cst_34 = arith.constant -1.000000e+30 : f32
    %137 = vector.broadcast %cst_34 : f32 to vector<2x8x1xf32>
    %cst_35 = arith.constant 0.000000e+00 : f32
    %138 = vector.broadcast %cst_35 : f32 to vector<2x8x1xf32>
    %cst_36 = arith.constant 0.000000e+00 : f32
    %139 = vector.broadcast %cst_36 : f32 to vector<2x8x8xf32>
    "tpu.trace_start"() <{level = 10 : i32, message = "bqd,bkd->bqk"}> : () -> ()
    %cst_37 = arith.constant dense<0.000000e+00> : vector<2x8x8xf32>
    %140 = tpu.matmul %130, %133, %cst_37 {dimension_numbers = #tpu.dot_dimension_numbers<[2], [2], [1], [1], [0, 0, 0, 1, 1, 1], [0], [0]>} : vector<2x8x8xbf16>, vector<2x8x8xbf16>, vector<2x8x8xf32> -> vector<2x8x8xf32>
    "tpu.trace_stop"() : () -> ()
    %cst_38 = arith.constant 0.353553385 : f32
    %141 = vector.broadcast %cst_38 : f32 to vector<2x8x8xf32>
    %142 = arith.mulf %140, %141 : vector<2x8x8xf32>
    %143 = vector.broadcast %13 : vector<1x8x8xf32> to vector<2x8x8xf32>
    %144 = arith.addf %142, %143 : vector<2x8x8xf32>
    %cst_39 = arith.constant dense<0xFF800000> : vector<2x8xf32>
    %145 = vector.multi_reduction <maximumf>, %144, %cst_39 [2] : vector<2x8x8xf32> to vector<2x8xf32>
    %146 = vector.shape_cast %145 : vector<2x8xf32> to vector<2x8x1xf32>
    %147 = arith.maximumf %137, %146 : vector<2x8x1xf32>
    %148 = arith.subf %137, %147 : vector<2x8x1xf32>
    %149 = math.exp %148 : vector<2x8x1xf32>
    %150 = vector.broadcast %147 : vector<2x8x1xf32> to vector<2x8x8xf32>
    %151 = arith.subf %144, %150 : vector<2x8x8xf32>
    %152 = math.exp %151 : vector<2x8x8xf32>
    %153 = arith.mulf %149, %138 : vector<2x8x1xf32>
    %cst_40 = arith.constant dense<0.000000e+00> : vector<2x8xf32>
    %154 = vector.multi_reduction <add>, %152, %cst_40 [2] : vector<2x8x8xf32> to vector<2x8xf32>
    %155 = vector.shape_cast %154 : vector<2x8xf32> to vector<2x8x1xf32>
    %156 = arith.addf %153, %155 : vector<2x8x1xf32>
    %157 = vector.broadcast %149 : vector<2x8x1xf32> to vector<2x8x8xf32>
    %158 = arith.mulf %157, %139 : vector<2x8x8xf32>
    %159 = arith.truncf %152 : vector<2x8x8xf32> to vector<2x8x8xbf16>
    "tpu.trace_start"() <{level = 10 : i32, message = "bqk,bkd->bqd"}> : () -> ()
    %cst_41 = arith.constant dense<0.000000e+00> : vector<2x8x8xf32>
    %160 = tpu.matmul %159, %136, %cst_41 {dimension_numbers = #tpu.dot_dimension_numbers<[2], [1], [1], [2], [0, 0, 0, 1, 1, 2], [0], [0]>} : vector<2x8x8xbf16>, vector<2x8x8xbf16>, vector<2x8x8xf32> -> vector<2x8x8xf32>
    "tpu.trace_stop"() : () -> ()
    %161 = arith.addf %158, %160 : vector<2x8x8xf32>
    %162 = tpu.reciprocal %156 : vector<2x8x1xf32> -> vector<2x8x1xf32>
    %163 = vector.broadcast %162 : vector<2x8x1xf32> to vector<2x8x8xf32>
    %164 = arith.mulf %161, %163 : vector<2x8x8xf32>
    %165 = vector.shape_cast %164 : vector<2x8x8xf32> to vector<16x8xf32>
    %166 = tpu.concatenate %51, %89, %127, %165 in 1 : vector<16x8xf32>, vector<16x8xf32>, vector<16x8xf32>, vector<16x8xf32> -> vector<16x32xf32>
    %167 = arith.truncf %166 : vector<16x32xf32> to vector<16x32xbf16>
    %c0_42 = arith.constant 0 : index
    %c0_43 = arith.constant 0 : index
    %c0_44 = arith.constant 0 : index
    %168 = vector.load %arg5[%c0_42, %c0_43, %c0_44] : memref<1x32x32xbf16, #tpu.memory_space<vmem>>, vector<1x32x32xbf16>
    %169 = vector.shape_cast %168 : vector<1x32x32xbf16> to vector<32x32xbf16>
    %cst_45 = arith.constant dense<0.000000e+00> : vector<16x32xf32>
    %170 = tpu.matmul %167, %169, %cst_45 {dimension_numbers = #tpu.dot_dimension_numbers<[1], [0], [0], [1], [0, 0, 1, 1], [], []>} : vector<16x32xbf16>, vector<32x32xbf16>, vector<16x32xf32> -> vector<16x32xf32>
    %c0_46 = arith.constant 0 : index
    %c0_47 = arith.constant 0 : index
    %c0_48 = arith.constant 0 : index
    %171 = vector.load %arg6[%c0_46, %c0_47, %c0_48] : memref<1x1x32xf32, #tpu.memory_space<vmem>>, vector<1x1x32xf32>
    %172 = vector.shape_cast %171 : vector<1x1x32xf32> to vector<1x32xf32>
    %173 = vector.broadcast %172 : vector<1x32xf32> to vector<16x32xf32>
    %174 = arith.addf %170, %173 : vector<16x32xf32>
    %175 = arith.addf %3, %174 : vector<16x32xf32>
    %c0_49 = arith.constant 0 : index
    %c0_50 = arith.constant 0 : index
    %c0_51 = arith.constant 0 : index
    %176 = vector.load %arg7[%c0_49, %c0_50, %c0_51] : memref<1x1x32xf32, #tpu.memory_space<vmem>>, vector<1x1x32xf32>
    %177 = vector.shape_cast %176 : vector<1x1x32xf32> to vector<1x32xf32>
    %c0_52 = arith.constant 0 : index
    %c0_53 = arith.constant 0 : index
    %c0_54 = arith.constant 0 : index
    %178 = vector.load %arg8[%c0_52, %c0_53, %c0_54] : memref<1x1x32xf32, #tpu.memory_space<vmem>>, vector<1x1x32xf32>
    %179 = vector.shape_cast %178 : vector<1x1x32xf32> to vector<1x32xf32>
    %cst_55 = arith.constant dense<0.000000e+00> : vector<16xf32>
    %180 = vector.multi_reduction <add>, %175, %cst_55 [1] : vector<16x32xf32> to vector<16xf32>
    %181 = vector.shape_cast %180 : vector<16xf32> to vector<16x1xf32>
    %cst_56 = arith.constant 3.200000e+01 : f32
    %182 = vector.broadcast %cst_56 : f32 to vector<16x1xf32>
    %183 = arith.divf %181, %182 : vector<16x1xf32>
    %184 = vector.broadcast %183 : vector<16x1xf32> to vector<16x32xf32>
    %185 = arith.subf %175, %184 : vector<16x32xf32>
    %186 = arith.mulf %185, %185 : vector<16x32xf32>
    %cst_57 = arith.constant dense<0.000000e+00> : vector<16xf32>
    %187 = vector.multi_reduction <add>, %186, %cst_57 [1] : vector<16x32xf32> to vector<16xf32>
    %188 = vector.shape_cast %187 : vector<16xf32> to vector<16x1xf32>
    %cst_58 = arith.constant 3.200000e+01 : f32
    %189 = vector.broadcast %cst_58 : f32 to vector<16x1xf32>
    %190 = arith.divf %188, %189 : vector<16x1xf32>
    %191 = vector.broadcast %183 : vector<16x1xf32> to vector<16x32xf32>
    %192 = arith.subf %175, %191 : vector<16x32xf32>
    %cst_59 = arith.constant 9.99999974E-6 : f32
    %193 = vector.broadcast %cst_59 : f32 to vector<16x1xf32>
    %194 = arith.addf %190, %193 : vector<16x1xf32>
    %195 = math.rsqrt %194 : vector<16x1xf32>
    %196 = vector.broadcast %195 : vector<16x1xf32> to vector<16x32xf32>
    %197 = arith.mulf %192, %196 : vector<16x32xf32>
    %198 = vector.broadcast %177 : vector<1x32xf32> to vector<16x32xf32>
    %199 = arith.mulf %197, %198 : vector<16x32xf32>
    %200 = vector.broadcast %179 : vector<1x32xf32> to vector<16x32xf32>
    %201 = arith.addf %199, %200 : vector<16x32xf32>
    %202 = arith.truncf %201 : vector<16x32xf32> to vector<16x32xbf16>
    %c0_60 = arith.constant 0 : index
    %c0_61 = arith.constant 0 : index
    %c0_62 = arith.constant 0 : index
    %203 = vector.load %arg9[%c0_60, %c0_61, %c0_62] : memref<1x32x128xbf16, #tpu.memory_space<vmem>>, vector<1x32x128xbf16>
    %204 = vector.shape_cast %203 : vector<1x32x128xbf16> to vector<32x128xbf16>
    %cst_63 = arith.constant dense<0.000000e+00> : vector<16x128xf32>
    %205 = tpu.matmul %202, %204, %cst_63 {dimension_numbers = #tpu.dot_dimension_numbers<[1], [0], [0], [1], [0, 0, 1, 1], [], []>} : vector<16x32xbf16>, vector<32x128xbf16>, vector<16x128xf32> -> vector<16x128xf32>
    %c0_64 = arith.constant 0 : index
    %c0_65 = arith.constant 0 : index
    %c0_66 = arith.constant 0 : index
    %206 = vector.load %arg10[%c0_64, %c0_65, %c0_66] : memref<1x1x128xf32, #tpu.memory_space<vmem>>, vector<1x1x128xf32>
    %207 = vector.shape_cast %206 : vector<1x1x128xf32> to vector<1x128xf32>
    %208 = vector.broadcast %207 : vector<1x128xf32> to vector<16x128xf32>
    %209 = arith.addf %205, %208 : vector<16x128xf32>
    %210 = vector.extract_strided_slice %209 {offsets = [0, 0], sizes = [16, 64], strides = [1, 1]} : vector<16x128xf32> to vector<16x64xf32>
    %211 = vector.extract_strided_slice %209 {offsets = [0, 64], sizes = [16, 64], strides = [1, 1]} : vector<16x128xf32> to vector<16x64xf32>
    %212 = arith.negf %211 : vector<16x64xf32>
    %213 = math.exp %212 : vector<16x64xf32>
    %cst_67 = arith.constant 1.000000e+00 : f32
    %214 = vector.broadcast %cst_67 : f32 to vector<16x64xf32>
    %215 = arith.addf %214, %213 : vector<16x64xf32>
    %216 = arith.divf %214, %215 : vector<16x64xf32>
    %217 = arith.mulf %210, %216 : vector<16x64xf32>
    %218 = arith.truncf %217 : vector<16x64xf32> to vector<16x64xbf16>
    %c0_68 = arith.constant 0 : index
    %c0_69 = arith.constant 0 : index
    %c0_70 = arith.constant 0 : index
    %219 = vector.load %arg11[%c0_68, %c0_69, %c0_70] : memref<1x64x32xbf16, #tpu.memory_space<vmem>>, vector<1x64x32xbf16>
    %220 = vector.shape_cast %219 : vector<1x64x32xbf16> to vector<64x32xbf16>
    %cst_71 = arith.constant dense<0.000000e+00> : vector<16x32xf32>
    %221 = tpu.matmul %218, %220, %cst_71 {dimension_numbers = #tpu.dot_dimension_numbers<[1], [0], [0], [1], [0, 0, 1, 1], [], []>} : vector<16x64xbf16>, vector<64x32xbf16>, vector<16x32xf32> -> vector<16x32xf32>
    %c0_72 = arith.constant 0 : index
    %c0_73 = arith.constant 0 : index
    %c0_74 = arith.constant 0 : index
    %222 = vector.load %arg12[%c0_72, %c0_73, %c0_74] : memref<1x1x32xf32, #tpu.memory_space<vmem>>, vector<1x1x32xf32>
    %223 = vector.shape_cast %222 : vector<1x1x32xf32> to vector<1x32xf32>
    %224 = vector.broadcast %223 : vector<1x32xf32> to vector<16x32xf32>
    %225 = arith.addf %221, %224 : vector<16x32xf32>
    %226 = arith.addf %201, %225 : vector<16x32xf32>
    %c0_75 = arith.constant 0 : index
    %c0_76 = arith.constant 0 : index
    %c0_77 = arith.constant 0 : index
    %227 = vector.load %arg13[%c0_75, %c0_76, %c0_77] : memref<1x1x32xf32, #tpu.memory_space<vmem>>, vector<1x1x32xf32>
    %228 = vector.shape_cast %227 : vector<1x1x32xf32> to vector<1x32xf32>
    %c0_78 = arith.constant 0 : index
    %c0_79 = arith.constant 0 : index
    %c0_80 = arith.constant 0 : index
    %229 = vector.load %arg14[%c0_78, %c0_79, %c0_80] : memref<1x1x32xf32, #tpu.memory_space<vmem>>, vector<1x1x32xf32>
    %230 = vector.shape_cast %229 : vector<1x1x32xf32> to vector<1x32xf32>
    %cst_81 = arith.constant dense<0.000000e+00> : vector<16xf32>
    %231 = vector.multi_reduction <add>, %226, %cst_81 [1] : vector<16x32xf32> to vector<16xf32>
    %232 = vector.shape_cast %231 : vector<16xf32> to vector<16x1xf32>
    %cst_82 = arith.constant 3.200000e+01 : f32
    %233 = vector.broadcast %cst_82 : f32 to vector<16x1xf32>
    %234 = arith.divf %232, %233 : vector<16x1xf32>
    %235 = vector.broadcast %234 : vector<16x1xf32> to vector<16x32xf32>
    %236 = arith.subf %226, %235 : vector<16x32xf32>
    %237 = arith.mulf %236, %236 : vector<16x32xf32>
    %cst_83 = arith.constant dense<0.000000e+00> : vector<16xf32>
    %238 = vector.multi_reduction <add>, %237, %cst_83 [1] : vector<16x32xf32> to vector<16xf32>
    %239 = vector.shape_cast %238 : vector<16xf32> to vector<16x1xf32>
    %cst_84 = arith.constant 3.200000e+01 : f32
    %240 = vector.broadcast %cst_84 : f32 to vector<16x1xf32>
    %241 = arith.divf %239, %240 : vector<16x1xf32>
    %242 = vector.broadcast %234 : vector<16x1xf32> to vector<16x32xf32>
    %243 = arith.subf %226, %242 : vector<16x32xf32>
    %cst_85 = arith.constant 9.99999974E-6 : f32
    %244 = vector.broadcast %cst_85 : f32 to vector<16x1xf32>
    %245 = arith.addf %241, %244 : vector<16x1xf32>
    %246 = math.rsqrt %245 : vector<16x1xf32>
    %247 = vector.broadcast %246 : vector<16x1xf32> to vector<16x32xf32>
    %248 = arith.mulf %243, %247 : vector<16x32xf32>
    %249 = vector.broadcast %228 : vector<1x32xf32> to vector<16x32xf32>
    %250 = arith.mulf %248, %249 : vector<16x32xf32>
    %251 = vector.broadcast %230 : vector<1x32xf32> to vector<16x32xf32>
    %252 = arith.addf %250, %251 : vector<16x32xf32>
    %c0_86 = arith.constant 0 : index
    %c0_87 = arith.constant 0 : index
    %253 = vector.load %arg16[%c0_86, %c0_87] : memref<16x32xf32, #tpu.memory_space<vmem>>, vector<16x32xf32>
    tpu.vector_store %arg16[%c0_86, %c0_87], %252 {strides = array<i32>} : memref<16x32xf32, #tpu.memory_space<vmem>>, vector<16x32xf32>,
    %c1_i32 = arith.constant 1 : i32
    %254 = arith.cmpi eq, %arg1, %c1_i32 : i32
    %255 = arith.extui %254 : i1 to i32
    %c0_i32_88 = arith.constant 0 : i32
    %256 = arith.cmpi ne, %255, %c0_i32_88 : i32
    scf.if %256 {
      %c0_89 = arith.constant 0 : index
      %c0_90 = arith.constant 0 : index
      %257 = vector.load %arg15[%c0_89, %c0_90] : memref<16x32xf32, #tpu.memory_space<vmem>>, vector<16x32xf32>
      tpu.vector_store %arg15[%c0_89, %c0_90], %252 {strides = array<i32>} : memref<16x32xf32, #tpu.memory_space<vmem>>, vector<16x32xf32>,
    } else {
    }
    return
  }
  func.func @transform_0(%arg0: i32, %arg1: i32) -> (i32, i32) {
    %c0_i32 = arith.constant 0 : i32
    %c0_i32_0 = arith.constant 0 : i32
    return %arg0, %c0_i32 : i32, i32
  }
  func.func @transform_1(%arg0: i32, %arg1: i32) -> (i32, i32, i32) {
    %c0_i32 = arith.constant 0 : i32
    %c0_i32_0 = arith.constant 0 : i32
    %c0_i32_1 = arith.constant 0 : i32
    return %arg1, %c0_i32, %c0_i32_0 : i32, i32, i32
  }
  func.func @transform_2(%arg0: i32, %arg1: i32) -> (i32, i32, i32) {
    %c0_i32 = arith.constant 0 : i32
    %c0_i32_0 = arith.constant 0 : i32
    %c0_i32_1 = arith.constant 0 : i32
    return %arg1, %c0_i32, %c0_i32_0 : i32, i32, i32
  }
  func.func @transform_3(%arg0: i32, %arg1: i32) -> (i32, i32, i32) {
    %c0_i32 = arith.constant 0 : i32
    %c0_i32_0 = arith.constant 0 : i32
    %c0_i32_1 = arith.constant 0 : i32
    return %arg1, %c0_i32, %c0_i32_0 : i32, i32, i32
  }
  func.func @transform_4(%arg0: i32, %arg1: i32) -> (i32, i32, i32) {
    %c0_i32 = arith.constant 0 : i32
    %c0_i32_0 = arith.constant 0 : i32
    %c0_i32_1 = arith.constant 0 : i32
    return %arg1, %c0_i32, %c0_i32_0 : i32, i32, i32
  }
  func.func @transform_5(%arg0: i32, %arg1: i32) -> (i32, i32, i32) {
    %c0_i32 = arith.constant 0 : i32
    %c0_i32_0 = arith.constant 0 : i32
    %c0_i32_1 = arith.constant 0 : i32
    return %arg1, %c0_i32, %c0_i32_0 : i32, i32, i32
  }
  func.func @transform_6(%arg0: i32, %arg1: i32) -> (i32, i32, i32) {
    %c0_i32 = arith.constant 0 : i32
    %c0_i32_0 = arith.constant 0 : i32
    %c0_i32_1 = arith.constant 0 : i32
    return %arg1, %c0_i32, %c0_i32_0 : i32, i32, i32
  }
  func.func @transform_7(%arg0: i32, %arg1: i32) -> (i32, i32, i32) {
    %c0_i32 = arith.constant 0 : i32
    %c0_i32_0 = arith.constant 0 : i32
    %c0_i32_1 = arith.constant 0 : i32
    return %arg1, %c0_i32, %c0_i32_0 : i32, i32, i32
  }
  func.func @transform_8(%arg0: i32, %arg1: i32) -> (i32, i32, i32) {
    %c0_i32 = arith.constant 0 : i32
    %c0_i32_0 = arith.constant 0 : i32
    %c0_i32_1 = arith.constant 0 : i32
    return %arg1, %c0_i32, %c0_i32_0 : i32, i32, i32
  }
  func.func @transform_9(%arg0: i32, %arg1: i32) -> (i32, i32, i32) {
    %c0_i32 = arith.constant 0 : i32
    %c0_i32_0 = arith.constant 0 : i32
    %c0_i32_1 = arith.constant 0 : i32
    return %arg1, %c0_i32, %c0_i32_0 : i32, i32, i32
  }
  func.func @transform_10(%arg0: i32, %arg1: i32) -> (i32, i32, i32) {
    %c0_i32 = arith.constant 0 : i32
    %c0_i32_0 = arith.constant 0 : i32
    %c0_i32_1 = arith.constant 0 : i32
    return %arg1, %c0_i32, %c0_i32_0 : i32, i32, i32
  }
  func.func @transform_11(%arg0: i32, %arg1: i32) -> (i32, i32, i32) {
    %c0_i32 = arith.constant 0 : i32
    %c0_i32_0 = arith.constant 0 : i32
    %c0_i32_1 = arith.constant 0 : i32
    return %arg1, %c0_i32, %c0_i32_0 : i32, i32, i32
  }
  func.func @transform_12(%arg0: i32, %arg1: i32) -> (i32, i32, i32) {
    %c0_i32 = arith.constant 0 : i32
    %c0_i32_0 = arith.constant 0 : i32
    %c0_i32_1 = arith.constant 0 : i32
    return %arg1, %c0_i32, %c0_i32_0 : i32, i32, i32
  }
  func.func @transform_13(%arg0: i32, %arg1: i32) -> (i32, i32) {
    %c0_i32 = arith.constant 0 : i32
    %c0_i32_0 = arith.constant 0 : i32
    return %arg0, %c0_i32 : i32, i32
  }
}

</mosaic_0001>

<bundles_post_ra>
// kernel: tpu_custom_call.1
= control target key start
LH: loop header
LB: loop body
LE: loop exit
PB: predicated region body
PF: predicated region fallthrough
CT: control target
= control target key end

     0   :  { %s3761_s0 = inlined_call_operand.hbm [shape: f32[16,32], index: 0, kind: input, shape index: {}]   ;;  %s3762_s1 = inlined_call_operand.vmem [shape: bf16[2,32,96], index: 1, kind: input, shape index: {}]   ;;  %s3763_s2 = inlined_call_operand.vmem [shape: f32[2,1,96], index: 2, kind: input, shape index: {}]   ;;  %s3764_s3 = inlined_call_operand.vmem [shape: bf16[2,32,32], index: 3, kind: input, shape index: {}]   ;;  %s3765_s4 = inlined_call_operand.hbm [shape: f32[2,1,32], index: 4, kind: input, shape index: {}]   ;;  %s3766_s5 = inlined_call_operand.hbm [shape: f32[2,1,32], index: 5, kind: input, shape index: {}]   ;;  %s3767_s6 = inlined_call_operand.hbm [shape: f32[2,1,32], index: 6, kind: input, shape index: {}]   ;;  %s3768_s7 = inlined_call_operand.vmem [shape: bf16[2,32,128], index: 7, kind: input, shape index: {}]   ;;  %s3769_s8 = inlined_call_operand.hbm [shape: f32[2,1,128], index: 8, kind: input, shape index: {}]   ;;  %s3770_s9 = inlined_call_operand.vmem [shape: bf16[2,64,32], index: 9, kind: input, shape index: {}]   ;;  %s3771_s10 = inlined_call_operand.vmem [shape: f32[2,1,32], index: 10, kind: input, shape index: {}]   ;;  %s3772_s11 = inlined_call_operand.vmem [shape: f32[2,1,32], index: 11, kind: input, shape index: {}]   ;;  %s3773_s12 = inlined_call_operand.vmem [shape: f32[2,1,32], index: 12, kind: input, shape index: {}]   ;;  %s3774_s13 = inlined_call_operand.hbm [shape: f32[16,32], index: 13, kind: output, shape index: {}]  }
   0x1   :  { %3787 = sst [smem:[#allocation23_spill]] %s3761_s0 }
   0x2   :  { %3788 = sst [smem:[#allocation24_spill]] %s3762_s1 }
   0x3   :  { %3789 = sst [smem:[#allocation25_spill]] %s3764_s3 }
   0x4   :  { %3790 = sst [smem:[#allocation26_spill]] %s3765_s4 }
   0x5   :  { %3791 = sst [smem:[#allocation27_spill]] %s3767_s6 }
   0x6   :  { %3792 = sst [smem:[#allocation28_spill]] %s3768_s7 }
   0x7   :  { %3793 = sst [smem:[#allocation29_spill]] %s3770_s9 }
   0x8   :  { %3794 = sst [smem:[#allocation30_spill]] %s3771_s10 }
   0x9   :  { %3795 = sst [smem:[#allocation31_spill]] %s3772_s11 }
   0xa   :  { %3796 = sst [smem:[#allocation32_spill]] %s3773_s12 }
   0xb   :  { %3797 = sst [smem:[#allocation33_spill]] %s3774_s13 }
   0xc   :  { %18 = vsyncpa [#allocation5], 0 }
   0xd   :  { %19 = vsyncpa [#allocation8], 0 }
   0xe   :  { %21 = vsyncpa [#allocation8 + $0x1], 0 }
   0xf   :  { %22 = vsyncpa [#allocation11], 0 }
  0x10   :  { %24 = vsyncpa [#allocation11 + $0x1], 0 }
  0x11   :  { %25 = vsyncpa [#allocation6], 0  ;;  %s3134_s25 = smov 0   ;;  %s3136_s26 = smov 0  }
  0x12   :  { %s3138_s27 = smov 0   ;;  %s3140_s28 = smov 0  }
  0x13   :  { %s3142_s29 = smov 0   ;;  %s3144_s30 = smov 0  }
  0x14 LB: > { %3798 = sst [smem:[#allocation18_spill]] %s3024_s27  ;;  %s40_s14 = sadd.s32 1, %s3032_s29  ;;  %s3036_s30 = sphi %s3144_s30, %s31_s30   ;;  %s3032_s29 = sphi %s3142_s29, %s3840_s29   ;;  %s3028_s28 = sphi %s3140_s28, %s3839_s28   ;;  %s3024_s27 = sphi %s3138_s27, %s3838_s27   ;;  %s3020_s26 = sphi %s3136_s26, %s3842_s26   ;;  %s3016_s25 = sphi %s3134_s25, %s3841_s25  }
  0x15   : > { %3799 = sst [smem:[#allocation19_spill]] %s3032_s29  ;;  %s154_s15 = sadd.s32 1, %s3024_s27 }
  0x16   : > { %3800 = sst [smem:[#allocation20_spill]] %s3036_s30  ;;  %p41_p0 = scmp.ge.s32.totalorder %s40_s14, 2 }
  0x17   : > { %p161_p1 = scmp.ne.s32.totalorder %s3024_s27, %s3020_s26  ;;  %p162_p2 = scmp.eq.s32.totalorder %s3036_s30, 0 }
  0x18   : > { %s3844_s14 = smov (%p41_p0, %s40_s14), 0  ;;  %p2637_p4 = scmp.lt.s32.totalorder %s3036_s30, 2 }
  0x19   : > { %3801 = sst [smem:[#allocation21_spill]] %s3844_s14  ;;  %p163_p3 = por %p162_p2, %p161_p1 }
  0x1a   : > { %s151_s16 = ssub.s32 %s3032_s29, %s3844_s14  ;;  %s3176_s18 = sand.u32 1, %s3024_s27  }
  0x1b   : > { %p152_p5 = scmp.eq.s32.totalorder %s151_s16, 0  ;;  %s3179_s19 = sshll.u32 %s3032_s29, 4 }
  0x1c   : > { %s3803_s4 = sld [smem:[#allocation26_spill]]  ;;  %s466_s24 = scalar_lea.vmem [#allocation7], %s3176_s18 }
  0x1d   : > { %s3182_s20 = scalar_select %p152_p5, %s3024_s27, %s154_s15  }
  0x1e   : > { %s473_s17 = sshll.u32 %s466_s24, 4  ;;  %p3191_p6 = pnand %p2637_p4, %p163_p3  ;;  %s3195_s17 = int_to_ptr.vmem [resolvable:$true] %s473_s17 }
  0x1f   : > { %3802 = sst [smem:[#allocation22_spill]] %s3182_s20  ;;  %s3805_s15 = sand.u32 1, %s3036_s30  }
  0x20   : > { %s3804_s16 = scalar_select %p3191_p6, 1, 0 }
  0x21   : > { %s3199_s14 = scalar_lea.sflag [#allocation8], %s3805_s15  ;;  %p3205_p8 = pneg %p3191_p6 }
  0x22   : > { %s3188_s23 = scalar_lea.hbm %s3803_s4, %s3179_s19  ;;  %s2805_s20 = scalar_lea.hbm %s3803_s4, 32 }
  0x23   : > { %s2800_s29 = scalar_lea.hbm %s3188_s23, 16  ;;  %p2806_p11 = scmp.lt.u32.totalorder %s3188_s23, %s3803_s4 }
  0x24   : > { %p2801_p7 = scmp.ne.s32.totalorder %s3188_s23, %s2800_s29  ;;  %p2807_p12 = scmp.lt.u32.totalorder %s2805_s20, %s2800_s29 }
  0x25   : > { %s3806_s21 = scalar_select %p3205_p8, 1, 0 }
  0x26   : > { %p2803_p9 = pnand %p3205_p8, %p2801_p7  ;;  %p2808_p13 = por %p2807_p12, %p2806_p11 }
  0x27   : > { %p2809_p0 = scmp.lt.u32.totalorder %s2800_s29, %s3188_s23 }
  0x28   : > { %p2804_p10 = pneg %p2803_p9 }
  0x29   : > { %p2810_p1 = por %p2809_p0, %p2808_p13 }
  0x2b   : > { %p2811_p2 = pnand %p2810_p1, %p2804_p10 }
  0x2d   : > { %2814 = shalt.err (!%p2811_p2)
}
  0x2e   : > { %s2815_s15 = scalar_lea.vmem %s3195_s17, 16  ;;  %s3038_s22 = smov [#allocation7]  }
  0x2f   : > { %p2816_p3 = scmp.ne.s32.totalorder %s3195_s17, %s2815_s15  ;;  %s2820_s24 = sshll.u32 %s3038_s22, 4  ;;  %s2821_s24 = int_to_ptr.vmem [resolvable:$false] %s2820_s24 }
  0x30   : > { %s2822_s13 = scalar_lea.vmem %s2821_s24, 32  ;;  %p2823_p7 = scmp.lt.s32.totalorder %s3195_s17, %s2821_s24 }
  0x31   : > { %p2818_p4 = pnand %p2816_p3, %p3205_p8  ;;  %p2824_p9 = scmp.lt.s32.totalorder %s2822_s13, %s2815_s15 }
  0x33   : > { %p2819_p5 = pneg %p2818_p4  ;;  %p2825_p11 = por %p2824_p9, %p2823_p7 }
  0x35   : > { %p2826_p12 = pnand %p2825_p11, %p2819_p5 }
  0x37   : > { %2829 = shalt.err (!%p2826_p12)
}
  0x38   : > { %2626 = dma.hbm_to_vmem [thread:$0]  (!%p3191_p6), %s3188_s23, 16, %s3195_s17, %s3199_s14  }
  0x39   : > { %s3807_s6 = sld [smem:[#allocation27_spill]]  ;;  %s500_s15 = scalar_lea.vmem [#allocation10], %s3176_s18 }
  0x3a   : > { %s507_s22 = sshll.u32 %s500_s15, 4  ;;  %s3808_s24 = sand.u32 1, %s3036_s30   ;;  %s508_s22 = int_to_ptr.vmem [resolvable:$true] %s507_s22 }
  0x3b   : > { %s3238_s13 = scalar_lea.sflag [#allocation11], %s3808_s24 }
  0x3f   : > { %s3233_s20 = scalar_lea.hbm %s3807_s6, %s3179_s19  ;;  %s2835_s27 = scalar_lea.hbm %s3807_s6, 32 }
  0x40   : > { %s2830_s4 = scalar_lea.hbm %s3233_s20, 16  ;;  %p2836_p1 = scmp.lt.u32.totalorder %s3233_s20, %s3807_s6 }
  0x41   : > { %p2831_p10 = scmp.ne.s32.totalorder %s3233_s20, %s2830_s4  ;;  %p2837_p2 = scmp.lt.u32.totalorder %s2835_s27, %s2830_s4 }
  0x42   : > { %p2839_p4 = scmp.lt.u32.totalorder %s2830_s4, %s3233_s20 }
  0x43   : > { %p2833_p13 = pnand %p2831_p10, %p3205_p8  ;;  %p2838_p3 = por %p2837_p2, %p2836_p1 }
  0x45   : > { %p2834_p0 = pneg %p2833_p13  ;;  %p2840_p5 = por %p2839_p4, %p2838_p3 }
  0x47   : > { %p2841_p7 = pnand %p2840_p5, %p2834_p0 }
  0x49   : > { %2844 = shalt.err (!%p2841_p7)
}
  0x4a   : > { %s2845_s15 = scalar_lea.vmem %s508_s22, 16  ;;  %s3039_s24 = smov [#allocation10]  }
  0x4b   : > { %p2846_p9 = scmp.ne.s32.totalorder %s508_s22, %s2845_s15  ;;  %s2850_s11 = sshll.u32 %s3039_s24, 4  ;;  %s2851_s11 = int_to_ptr.vmem [resolvable:$false] %s2850_s11 }
  0x4c   : > { %s2852_s17 = scalar_lea.vmem %s2851_s11, 32  ;;  %p2853_p10 = scmp.lt.s32.totalorder %s508_s22, %s2851_s11 }
  0x4d   : > { %p2848_p11 = pnand %p2846_p9, %p3205_p8  ;;  %p2854_p13 = scmp.lt.s32.totalorder %s2852_s17, %s2845_s15 }
  0x4f   : > { %p2849_p12 = pneg %p2848_p11  ;;  %p2855_p6 = por %p2854_p13, %p2853_p10 }
  0x51   : > { %p2856_p1 = pnand %p2855_p6, %p2849_p12 }
  0x53   : > { %2859 = shalt.err (!%p2856_p1)
}
  0x54   : > { %p3809_p2 = scmp.ne.s32.totalorder %s3804_s16, 0  ;;  %s3259_s4 = sadd.s32 4294967295, %s3036_s30  }
  0x55   : > { %p167_p0 = scmp.ne.s32.totalorder %s3020_s26, %s3016_s25  ;;  %p3782_p6 = scmp.eq.s32.totalorder %s3259_s4, 0 }
  0x56   : > { %2632 = dma.hbm_to_vmem [thread:$0]  (!%p3809_p2), %s3233_s20, 16, %s508_s22, %s3238_s13  }
  0x57   : > { %p2358_p3 = scmp.ge.s32.totalorder %s3036_s30, 1  ;;  %p412_p4 = scmp.lt.s32.totalorder %s3036_s30, 3 }
  0x58   : > { %p3268_p5 = por %p3782_p6, %p167_p0  ;;  %s3040_s20 = smov [#allocation4]  }
  0x59   : > { %p3272_p7 = pnand %p2358_p3, %p412_p4  ;;  %s427_s22 = sshll.u32 %s3040_s20, 4  ;;  %s428_s22 = int_to_ptr.vmem [resolvable:$true] %s427_s22 }
  0x5a   : > { %s3810_s11 = scalar_select %p3268_p5, 1, 0 }
  0x5b   : > { %s3811_s12 = scalar_select %p3272_p7, 1, 0 }
  0x5c   : > { %p2619_p9 = pneg %p3272_p7  ;;  %s3288_s29 = scalar_lea.hbm %s3766_s5, %s3179_s19 }
  0x5d   : > { %s483_s15 = scalar_lea.vmem [#allocation9], %s3176_s18  ;;  %s3813_s0 = sld [smem:[#allocation23_spill]] }
  0x5e   : > { %p3280_p11 = pnand %p2619_p9, %p3782_p6  ;;  %s490_s24 = sshll.u32 %s483_s15, 4  ;;  %s3291_s24 = int_to_ptr.vmem [resolvable:$true] %s490_s24 }
  0x60   : > { %p2862_p10 = pneg %p3280_p11 }
  0x63   : > { %s2860_s6 = scalar_lea.hbm %s3813_s0, 256 }
  0x64   : > { %p2861_p12 = scmp.ne.s32.totalorder %s3813_s0, %s2860_s6  ;;  %p2867_p0 = scmp.lt.u32.totalorder %s2860_s6, %s3813_s0 }
  0x66   : > { %p2863_p13 = pnand %p2862_p10, %p2861_p12 }
  0x68   : > { %p2864_p1 = pneg %p2863_p13 }
  0x6a   : > { %p2869_p3 = pnand %p2867_p0, %p2864_p1 }
  0x6c   : > { %2872 = shalt.err (!%p2869_p3)
}
  0x6d   : > { %s2873_s15 = scalar_lea.vmem %s428_s22, 256  ;;  %p2881_p5 = scmp.lt.s32.totalorder %s428_s22, %s428_s22 }
  0x6e   : > { %p2874_p4 = scmp.ne.s32.totalorder %s428_s22, %s2873_s15  ;;  %p2882_p7 = scmp.lt.s32.totalorder %s2873_s15, %s2873_s15 }
  0x70   : > { %p2876_p9 = pnand %p2874_p4, %p2862_p10  ;;  %p2883_p2 = por %p2882_p7, %p2881_p5 }
  0x72   : > { %p2877_p6 = pneg %p2876_p9 }
  0x74   : > { %p2884_p8 = pnand %p2883_p2, %p2877_p6 }
  0x76   : > { %2887 = shalt.err (!%p2884_p8)
}
  0x77   : > { %s3041_s10 = smov 128   ;;  %s3042_s30 = smov 8  }
  0x78   : > { %2622 = dma.hbm_to_vmem [thread:$0]  (!%p3280_p11), %s3813_s0, 256, %s428_s22, [#allocation5], %s3041_s10, %s3041_s10, %s3042_s30  }
  0x79   : > { %s2888_s20 = scalar_lea.hbm %s3288_s29, 16  ;;  %p3814_p10 = scmp.ne.s32.totalorder %s3806_s21, 0 }
  0x7a   : > { %p2889_p12 = scmp.ne.s32.totalorder %s3288_s29, %s2888_s20  ;;  %s2893_s15 = scalar_lea.hbm %s3766_s5, 32 }
  0x7b   : > { %p2894_p8 = scmp.lt.u32.totalorder %s3288_s29, %s3766_s5  ;;  %p2895_p2 = scmp.lt.u32.totalorder %s2893_s15, %s2888_s20 }
  0x7c   : > { %p2891_p13 = pnand %p2889_p12, %p3814_p10  ;;  %p2897_p7 = scmp.lt.u32.totalorder %s2888_s20, %s3288_s29 }
  0x7d   : > { %p2896_p6 = por %p2895_p2, %p2894_p8 }
  0x7e   : > { %p2892_p5 = pneg %p2891_p13 }
  0x7f   : > { %p2898_p1 = por %p2897_p7, %p2896_p6 }
  0x81   : > { %p2899_p0 = pnand %p2898_p1, %p2892_p5 }
  0x83   : > { %2902 = shalt.err (!%p2899_p0)
}
  0x84   : > { %s2903_s22 = scalar_lea.vmem %s3291_s24, 16  ;;  %s3043_s25 = smov [#allocation9]  }
  0x85   : > { %p2904_p11 = scmp.ne.s32.totalorder %s3291_s24, %s2903_s22  ;;  %s2908_s10 = sshll.u32 %s3043_s25, 4  ;;  %s2909_s10 = int_to_ptr.vmem [resolvable:$false] %s2908_s10 }
  0x86   : > { %s2910_s7 = scalar_lea.vmem %s2909_s10, 32  ;;  %p2911_p9 = scmp.lt.s32.totalorder %s3291_s24, %s2909_s10 }
  0x87   : > { %p2906_p3 = pnand %p2904_p11, %p3814_p10  ;;  %p2912_p12 = scmp.lt.s32.totalorder %s2910_s7, %s2903_s22 }
  0x89   : > { %p2907_p4 = pneg %p2906_p3  ;;  %p2913_p13 = por %p2912_p12, %p2911_p9 }
  0x8b   : > { %p2914_p8 = pnand %p2913_p13, %p2907_p4 }
  0x8d   : > { %2917 = shalt.err (!%p2914_p8)
}
  0x8e   : > { %p3815_p5 = scmp.ne.s32.totalorder %s3804_s16, 0  ;;  %s3335_s6 = scalar_lea.hbm %s3769_s8, %s3179_s19 }
  0x8f   : > { %s525_s17 = scalar_lea.vmem [#allocation12], %s3176_s18  ;;  %s2918_s23 = scalar_lea.hbm %s3335_s6, 16 }
  0x90   : > { %2629 = dma.hbm_to_vmem [thread:$0]  (!%p3815_p5), %s3288_s29, 16, %s3291_s24, %s3199_s14  }
  0x91   : > { %s532_s20 = sshll.u32 %s525_s17, 4  ;;  %p2919_p2 = scmp.ne.s32.totalorder %s3335_s6, %s2918_s23  ;;  %s533_s20 = int_to_ptr.vmem [resolvable:$true] %s532_s20 }
  0x92   : > { %s2923_s14 = scalar_lea.hbm %s3769_s8, 32  ;;  %p2924_p1 = scmp.lt.u32.totalorder %s3335_s6, %s3769_s8 }
  0x93   : > { %p2921_p6 = pnand %p2919_p2, %p3814_p10  ;;  %p2925_p0 = scmp.lt.u32.totalorder %s2923_s14, %s2918_s23 }
  0x94   : > { %p2927_p3 = scmp.lt.u32.totalorder %s2918_s23, %s3335_s6 }
  0x95   : > { %p2922_p7 = pneg %p2921_p6  ;;  %p2926_p11 = por %p2925_p0, %p2924_p1 }
  0x97   : > { %p2928_p4 = por %p2927_p3, %p2926_p11 }
  0x99   : > { %p2929_p9 = pnand %p2928_p4, %p2922_p7 }
  0x9b   : > { %2932 = shalt.err (!%p2929_p9)
}
  0x9c   : > { %s2933_s18 = scalar_lea.vmem %s533_s20, 16  ;;  %s3044_s19 = smov [#allocation12]  }
  0x9d   : > { %p2934_p12 = scmp.ne.s32.totalorder %s533_s20, %s2933_s18  ;;  %s2938_s22 = sshll.u32 %s3044_s19, 4  ;;  %s2939_s22 = int_to_ptr.vmem [resolvable:$false] %s2938_s22 }
  0x9e   : > { %s2940_s25 = scalar_lea.vmem %s2939_s22, 32  ;;  %p2941_p2 = scmp.lt.s32.totalorder %s533_s20, %s2939_s22 }
  0x9f   : > { %p2936_p13 = pnand %p2934_p12, %p3814_p10  ;;  %p2942_p6 = scmp.lt.s32.totalorder %s2940_s25, %s2933_s18 }
  0xa1   : > { %p2937_p8 = pneg %p2936_p13  ;;  %p2943_p5 = por %p2942_p6, %p2941_p2 }
  0xa3   : > { %p2944_p0 = pnand %p2943_p5, %p2937_p8 }
  0xa5   : > { %2947 = shalt.err (!%p2944_p0)
}
  0xa6   : > { %p3816_p1 = scmp.ne.s32.totalorder %s3804_s16, 0  ;;  %p3817_p7 = scmp.ne.s32.totalorder %s3811_s12, 0 }
  0xa7   : > { %p3818_p10 = scmp.eq.s32.totalorder (!%p3817_p7), %s3259_s4, 0 }
  0xa8   : > { %2635 = dma.hbm_to_vmem [thread:$0]  (!%p3816_p1), %s3335_s6, 16, %s533_s20, %s3238_s13  }
  0xa9   : > { %567 = sbr.rel (%p3817_p7) target bundleno = 3886 (0xf2e), region = 72 }
  0xb0   : > { %2999 = dma.done.wait (%p3818_p10), [#allocation5], 256   ;;  %p3819_p11 = pmov %p3818_p10 }
  0xb1   : > { %s573_s21 = sand.u32 1, %s3259_s4   ;;  %s3364_s10 = sand.u32 1, %s3020_s26  }
  0xb2   : > { %3001 = vsyncadd (%p3819_p11), [#allocation5], 4294967040  ;;  %s574_s16 = scalar_lea.sflag [#allocation8], %s573_s21  ;;  %p3820_p5 = scmp.ne.s32.totalorder %s3810_s11, 0 }
  0xb4   : > { %3003 = dma.done.wait (%p3820_p5), %s574_s16, 32  }
  0xb5   : > { %3005 = vsyncadd (%p3820_p5), %s574_s16, 4294967264  ;;  %s590_s12 = scalar_lea.sflag [#allocation11], %s573_s21 }
  0xb6   : > { %3007 = dma.done.wait (%p3820_p5), %s590_s12, 32  }
  0xb7   : > { %3009 = vsyncadd (%p3820_p5), %s590_s12, 4294967264  ;;  %p682_p3 = scmp.lt.s32.totalorder %s3028_s28, 1  ;;  %s3821_s1 = sld [smem:[#allocation24_spill]] }
  0xb8   : > { %s3822_s3 = sld [smem:[#allocation25_spill]]  ;;  %s3823_s22 = sld [smem:[#allocation28_spill]] }
  0xb9   : > { %s3379_s30 = scalar_select %p682_p3, %s3028_s28, 1 }
  0xba   : > { %s3824_s9 = sld [smem:[#allocation29_spill]]  ;;  %s3825_s27 = sld [smem:[#allocation30_spill]] }
  0xbb   : > { %s2421_s6 = sshll.u32 %s3379_s30, 4  ;;  %s2424_s21 = sshll.u32 %s3379_s30, 5 }
  0xbc   : > { %s3826_s14 = sld [smem:[#allocation31_spill]]  ;;  %p2375_p4 = scmp.ne.s32.totalorder %s3028_s28, 0 }
  0xbd   : > { %s686_s15 = scalar_lea.vmem %s3821_s1, %s2421_s6  ;;  %v720_v0 = vld [vmem:[#allocation4] sm:$0xff] (!%p2375_p4)  ;;  %vm722_vm0 = vcmask (!%p2375_p4), 261120   ;;  %v721_v1 = vld [vmem:[#allocation4 + $0x8] sm:$0xff] (!%p2375_p4)  ;;  %v725_v2 = vlaneseq (!%p2375_p4)  ;;  %vm731_vm1 = vcmask (!%p2375_p4), 64512   ;;  %v3045_v5 = vmov (!%p2375_p4), -1e+09  }
  0xbe   : > { %s3392_s24 = scalar_lea.vmem %s3822_s3, %s2421_s6  ;;  %s3397_s25 = scalar_lea.vmem %s3823_s22, %s2421_s6  ;;  %723 = vst.msk [vmem:[#allocation2] sm:$0xff] (!%p2375_p4), %vm722_vm0, %v720_v0  ;;  %724 = vst.msk [vmem:[#allocation2 + $0x8] sm:$0xff] (!%p2375_p4), %vm722_vm0, %v721_v1 }
  0xbf   : > { %s3827_s3 = sld [smem:[#allocation32_spill]]  ;;  %s600_s6 = scalar_lea.vmem [#allocation12], %s3364_s10  ;;  %v726_v3 = vshrl.u32 (!%p2375_p4), %v725_v2, 7  ;;  %v728_v4 = vand.u32 (!%p2375_p4), 127, %v725_v2 }
  0xc0   : > { %s3403_s17 = scalar_lea.vmem %s3824_s9, %s2424_s21  ;;  %s707_s11 = scalar_lea.vmem %s3825_s27, %s3379_s30 }
  0xc1   : > { %719 = sbr.rel (%p2375_p4) target bundleno = 200 (0xc8), region = 96  ;;  %vm729_vm2 = vcmp.ge.s32.totalorder (!%p2375_p4), %v726_v3, %v728_v4 }
  0xc2   : > { %s710_s29 = scalar_lea.vmem %s3826_s14, %s3379_s30  ;;  %v730_v6 = vsel (!%p2375_p4), %vm729_vm2, 0.0, %v3045_v5 }
  0xc3   : > { %732 = vst.msk [vmem:[#allocation3] sm:$0xff] (!%p2375_p4), %vm731_vm1, %v730_v6 }
  0xc5   : > { %s713_s18 = scalar_lea.vmem %s3827_s3, %s3379_s30 }
  0xc8 PF: > { %v2726_v7 = vld [vmem:[%s686_s15] sm:$0xff]   ;;  %v3046_v8 = vmov 0.0   ;;  %v2727_v9 = vld [vmem:[%s686_s15 + $0x8] sm:$0xff]   ;;  %vm3047_vm3 = vmmov 0   ;;  %vm759_vm4 = vcmask 261120   ;;  %s3828_s3 = scalar_lea.vmem %s3763_s2, %s3379_s30  ;;  %s3048_s7 = smov 96  }
  0xc9   : > { %2471 = vmatprep.subr.bf16.mxu0 %v3046_v8  ;;  %2479 = vmatprep.subr.bf16.mxu1 %v3046_v8  ;;  %v3423_v10 = vld [vmem:[#allocation2] sm:$0xff]  ;;  %v3425_v11 = vld [vmem:[#allocation2 + $0x8] sm:$0xff]  ;;  %s3049_s13 = smov 64   ;;  %s3050_s9 = smov 88   ;;  %vm810_vm5 = vcmask 64512   ;;  %vm947_vm6 = vcmask 1043456  }
  0xca   : > { %2472 = vmatpush3.bf16.msra.mxu0 %v2726_v7  ;;  %2475 = vmatprep.mubr.msk.bf16.mxu0 %vm3047_vm3, %v3046_v8  ;;  %v735_v12 = vpack.c.bf16 %v3425_v11, %v3423_v10  ;;  %v2376_v13 = vld [vmem:[%s3828_s3] ss:$0 sm:$0xff]  ;;  %s3051_s23 = smov 120   ;;  %v3467_v29 = vld [vmem:[#allocation3] sm:$0xff]  ;;  %s3052_s15 = smov 56   ;;  %vm1785_vm7 = vcmask 130048  }
  0xcb   : > { %2473 = vmatprep.subr.bf16.mxu0 %v3046_v8  ;;  %2481 = vmatprep.mubr.msk.bf16.mxu1 %vm3047_vm3, %v3046_v8  ;;  %s3053_s19 = smov 80   ;;  %s3054_s22 = smov 112   ;;  %vm1788_vm8 = vcmask 195584   ;;  %vm2036_vm9 = vcmask 523264  }
  0xcc   : > { %s3055_s21 = smov 48   ;;  %s3056_s16 = smov 72  }
  0xcd   : > { %s3057_s12 = smov 104   ;;  %s3058_s20 = smov 40  }
  0xce   : > { %2474 = vmatpush3.bf16.msra.mxu0 %v2727_v9  ;;  %s3059_s27 = smov 8   ;;  %s3060_s14 = smov 16  }
  0xcf   : > { %2485 = vmatprep.subr.bf16.mxu0 %v3046_v8  ;;  %s3061_s0 = smov 24   ;;  %s3830_s1 = scalar_lea.vmem [#allocation9], %s3364_s10 }
  0xd0   : > { %p2416_p9 = scmp.ne.s32.totalorder %s3028_s28, 1 }
  0xd1   : > { %2476 = vmatmul.mubr.msk.bf16.vlgmr.msra.gmra.mrb[0].mxu0 %vm759_vm4, %v735_v12 }
  0xd2   : > { %2487 = vmatprep.mubr.msk.bf16.mxu0 %vm3047_vm3, %v3046_v8 }
 0x1a4   : > { %v797_v14 = vpop.f32.mrb[0].mxu0 }
 0x1a5   : > { %v798_v15 = vadd.f32 %v2376_v13, %v797_v14  ;;  %v2477_v16 = vpop.f32.mrb[1].mxu0 }
 0x1a6   : > { %v800_v17 = vpop.f32.mrb[2].mxu0 }
 0x1a7   : > { %v3441_v18 = vpack.c.bf16 %v798_v15, %v798_v15  ;;  %v801_v19 = vadd.f32 %v2376_v13, %v800_v17  ;;  %v2478_v20 = vpop.f32.mrb[3].mxu0 }
 0x1a9   : > { %808 = vrot.lane.b32.xlu0 %v3441_v18, %s3048_s7  ;;  %v3444_v21 = vpack.c.bf16 %v801_v19, %v801_v19 }
 0x1ad   : > { %858 = vrot.lane.b32.xlu0 %v3444_v21, %s3048_s7 }
 0x1b1   : > { %942 = vrot.lane.b32.xlu0 %v3441_v18, %s3049_s13 }
 0x1b5   : > { %1047 = vrot.lane.b32.xlu0 %v3441_v18, %s3050_s9 }
 0x1b9   : > { %1097 = vrot.lane.b32.xlu0 %v3444_v21, %s3050_s9 }
 0x1bd   : > { %1045 = vrot.lane.b32.xlu0 %v3441_v18, %s3051_s23 }
 0x1c1   : > { %1095 = vrot.lane.b32.xlu0 %v3444_v21, %s3051_s23 }
 0x21b   : > { %v809_v22 = vpop.permute.xlu0 %808 }
 0x21c   : > { %v815_v23 = vsel %vm810_vm5, %v809_v22, 0 }
 0x21d   : > { %2480 = vmatpush3.bf16.xpose.msra.mxu1 %v815_v23 }
 0x21e   : > { %2491 = vmatprep.subr.bf16.mxu1 %v3046_v8 }
 0x21f   : > { %v859_v24 = vpop.permute.xlu0 %858 }
 0x220   : > { %v864_v25 = vsel %vm810_vm5, %v859_v24, 0 }
 0x221   : > { %2486 = vmatpush3.bf16.xpose.msra.mxu0 %v864_v25 }
 0x222   : > { %2497 = vmatprep.subr.bf16.mxu0 %v3046_v8 }
 0x223   : > { %v943_v26 = vpop.permute.xlu0 %942 }
 0x224   : > { %v949_v27 = vsel %vm947_vm6, %v943_v26, 0  ;;  %2482 = vmatmul.mubr.msk.bf16.vlgmr.msra.gmra.mrb[0].mxu1 %vm810_vm5, %v3441_v18 }
 0x225   : > { %2492 = vmatpush3.bf16.msra.mxu1 %v949_v27  ;;  %2493 = vmatprep.mubr.msk.bf16.mxu1 %vm3047_vm3, %v3046_v8 }
 0x226   : > { %2503 = vmatprep.subr.bf16.mxu1 %v3046_v8 }
 0x227   : > { %v1048_v53 = vpop.permute.xlu0 %1047 }
 0x228   : > { %2488 = vmatmul.mubr.msk.bf16.vlgmr.msra.gmra.mrb[4].mxu0 %vm810_vm5, %v3444_v21  ;;  %v1053_v57 = vsel %vm810_vm5, %v1048_v53, 0 }
 0x229   : > { %2499 = vmatprep.mubr.msk.bf16.mxu0 %vm3047_vm3, %v3046_v8 }
 0x22b   : > { %v1098_v56 = vpop.permute.xlu0 %1097 }
 0x22c   : > { %v1103_v60 = vsel %vm810_vm5, %v1098_v56, 0 }
 0x22f   : > { %v1046_v61 = vpop.permute.xlu0 %1045 }
 0x233   : > { %v1096_v62 = vpop.permute.xlu0 %1095 }
 0x2f7   : > { %v851_v28 = vpop.f32.mrb[0].mxu1 }
 0x2f8   : > { %v906_v30 = vmul.f32 0.35355338, %v851_v28  ;;  %v2483_v31 = vpop.f32.mrb[1].mxu1 }
 0x2f9   : > { %v854_v32 = vpop.f32.mrb[2].mxu1 }
 0x2fa   : > { %v2484_v33 = vpop.f32.mrb[3].mxu1  ;;  %v908_v34 = vadd.f32 %v906_v30, %v3467_v29 }
 0x2fb   : > { %v900_v35 = vpop.f32.mrb[4].mxu0 }
 0x2fc   : > { %v907_v36 = vmul.f32 0.35355338, %v900_v35  ;;  %v2489_v37 = vpop.f32.mrb[5].mxu0  ;;  %v910_v38 = vsel %vm810_vm5, %v908_v34, -inf }
 0x2fd   : > { %911 = vmax.xlane.f32.xlu1 %v910_v38  ;;  %v903_v39 = vpop.f32.mrb[6].mxu0 }
 0x2fe   : > { %v2490_v40 = vpop.f32.mrb[7].mxu0  ;;  %v909_v41 = vadd.f32 %v907_v36, %v3467_v29 }
 0x300   : > { %v913_v42 = vsel %vm810_vm5, %v909_v41, -inf }
 0x301   : > { %914 = vmax.xlane.f32.xlu1 %v913_v42 }
 0x312   : > { %991 = vrot.lane.b32.xlu1 %v3444_v21, %s3049_s13 }
 0x38a   : > { %v912_v43 = vpop.xlane.xlu1 %911 }
 0x38b   : > { %v916_v44 = vmax.f32 %v912_v43, -1e+30 }
 0x38d   : > { %v924_v45 = vsub.f32 %v908_v34, %v916_v44  ;;  %v918_v63 = vsub.f32 -1e+30, %v916_v44 }
 0x38e   : > { %v915_v46 = vpop.xlane.xlu1 %914 }
 0x38f   : > { %v926_v47 = vmul.f32 1.442695, %v924_v45  ;;  %v917_v48 = vmax.f32 %v915_v46, -1e+30  ;;  %v920_v0 = vmul.f32 1.442695, %v918_v63 }
 0x391   : > { %v925_v49 = vsub.f32 %v909_v41, %v917_v48  ;;  %2736 = vpow2.f32 %v926_v47  ;;  %v919_v1 = vsub.f32 -1e+30, %v917_v48 }
 0x392   : > { %v992_v50 = vpop.permute.xlu1 %991 }
 0x393   : > { %v928_v51 = vmul.f32 1.442695, %v925_v49  ;;  %v997_v52 = vsel %vm947_vm6, %v992_v50, 0  ;;  %v922_v2 = vmul.f32 1.442695, %v919_v1 }
 0x394   : > { %2498 = vmatpush3.bf16.msra.mxu0 %v997_v52 }
 0x395   : > { %2509 = vmatprep.subr.bf16.mxu0 %v3046_v8  ;;  %2738 = vpow2.f32 %v928_v51 }
 0x396   : > { %2740 = vpow2.f32 %v920_v0 }
 0x397   : > { %2742 = vpow2.f32 %v922_v2 }
 0x39b   : > { %v3477_v54 = vpop.eup %2736 }
 0x39c   : > { %v940_v55 = vpack.c.bf16 %v3477_v54, %v3477_v54 }
 0x39e   : > { %2494 = vmatmul.mubr.msk.bf16.vlgmr.msra.gmra.mrb[4].mxu1 %vm810_vm5, %v940_v55 }
 0x39f   : > { %v3483_v58 = vpop.eup %2738  ;;  %2504 = vmatpush3.bf16.xpose.msra.mxu1 %v1053_v57  ;;  %2505 = vmatprep.mubr.msk.bf16.mxu1 %vm3047_vm3, %v3046_v8 }
 0x3a0   : > { %v941_v59 = vpack.c.bf16 %v3483_v58, %v3483_v58  ;;  %2515 = vmatprep.subr.bf16.mxu1 %v3046_v8  ;;  %v2741_v3 = vpop.eup %2740 }
 0x3a1   : > { %v3501_v4 = vmul.f32 0.0, %v2741_v3  ;;  %v2743_v5 = vpop.eup %2742 }
 0x3a2   : > { %2500 = vmatmul.mubr.msk.bf16.vlgmr.msra.gmra.mrb[8].mxu0 %vm810_vm5, %v941_v59  ;;  %v3506_v14 = vmul.f32 0.0, %v2743_v5 }
 0x3a3   : > { %2510 = vmatpush3.bf16.xpose.msra.mxu0 %v1103_v60  ;;  %2511 = vmatprep.mubr.msk.bf16.mxu0 %vm3047_vm3, %v3046_v8 }
 0x3a4   : > { %2521 = vmatprep.subr.bf16.mxu0 %v3046_v8 }
 0x3a6   : > { %2506 = vmatmul.mubr.msk.bf16.vlgmr.msra.gmra.mrb[8].mxu1 %vm810_vm5, %v1046_v61 }
 0x3a7   : > { %2517 = vmatprep.mubr.msk.bf16.mxu1 %vm3047_vm3, %v3046_v8 }
 0x3aa   : > { %2512 = vmatmul.mubr.msk.bf16.vlgmr.msra.gmra.mrb[12].mxu0 %vm810_vm5, %v1096_v62 }
 0x3ab   : > { %2523 = vmatprep.mubr.msk.bf16.mxu0 %vm3047_vm3, %v3046_v8 }
 0x471   : > { %v985_v6 = vpop.f32.mrb[4].mxu1 }
 0x472   : > { %v3504_v7 = vadd.f32 %v985_v6, %v3501_v4  ;;  %v2495_v9 = vpop.f32.mrb[5].mxu1 }
 0x473   : > { %v988_v12 = vpop.f32.mrb[6].mxu1 }
 0x474   : > { %v2496_v13 = vpop.f32.mrb[7].mxu1 }
 0x475   : > { %v1033_v15 = vpop.f32.mrb[8].mxu0 }
 0x476   : > { %v3509_v16 = vadd.f32 %v1033_v15, %v3506_v14  ;;  %v2501_v17 = vpop.f32.mrb[9].mxu0 }
 0x477   : > { %v1036_v19 = vpop.f32.mrb[10].mxu0 }
 0x478   : > { %v2502_v20 = vpop.f32.mrb[11].mxu0 }
 0x479   : > { %v1089_v22 = vpop.f32.mrb[8].mxu1 }
 0x47a   : > { %v1145_v23 = vmul.f32 0.35355338, %v1089_v22  ;;  %v2507_v24 = vpop.f32.mrb[9].mxu1 }
 0x47b   : > { %v1092_v25 = vpop.f32.mrb[10].mxu1 }
 0x47c   : > { %v2508_v26 = vpop.f32.mrb[11].mxu1  ;;  %v1147_v27 = vadd.f32 %v1145_v23, %v3467_v29 }
 0x47d   : > { %v1139_v28 = vpop.f32.mrb[12].mxu0 }
 0x47e   : > { %v1146_v30 = vmul.f32 0.35355338, %v1139_v28  ;;  %v2513_v31 = vpop.f32.mrb[13].mxu0  ;;  %v1149_v32 = vsel %vm810_vm5, %v1147_v27, -inf }
 0x47f   : > { %1150 = vmax.xlane.f32.xlu1 %v1149_v32  ;;  %v1142_v33 = vpop.f32.mrb[14].mxu0 }
 0x480   : > { %v2514_v34 = vpop.f32.mrb[15].mxu0  ;;  %v1148_v35 = vadd.f32 %v1146_v30, %v3467_v29 }
 0x482   : > { %v1152_v36 = vsel %vm810_vm5, %v1148_v35, -inf }
 0x483   : > { %1153 = vmax.xlane.f32.xlu0 %v1152_v36 }
 0x490   : > { %1229 = vrot.lane.b32.xlu1 %v3444_v21, %s3052_s15 }
 0x494   : > { %1285 = vrot.lane.b32.xlu1 %v3441_v18, %s3053_s19 }
 0x498   : > { %1283 = vrot.lane.b32.xlu1 %v3441_v18, %s3054_s22 }
 0x499   : > { %1181 = vrot.lane.b32.xlu0 %v3441_v18, %s3052_s15 }
 0x49d   : > { %1335 = vrot.lane.b32.xlu0 %v3444_v21, %s3053_s19 }
 0x4a1   : > { %1333 = vrot.lane.b32.xlu0 %v3444_v21, %s3054_s22 }
 0x50c   : > { %v1151_v37 = vpop.xlane.xlu1 %1150 }
 0x50d   : > { %v1155_v38 = vmax.f32 %v1151_v37, -1e+30 }
 0x50f   : > { %v1163_v39 = vsub.f32 %v1147_v27, %v1155_v38  ;;  %v1157_v61 = vsub.f32 -1e+30, %v1155_v38 }
 0x510   : > { %v1230_v40 = vpop.permute.xlu1 %1229  ;;  %v1154_v41 = vpop.xlane.xlu0 %1153 }
 0x511   : > { %v1165_v42 = vmul.f32 1.442695, %v1163_v39  ;;  %v1235_v43 = vsel %vm947_vm6, %v1230_v40, 0  ;;  %v1156_v44 = vmax.f32 %v1154_v41, -1e+30 }
 0x512   : > { %2522 = vmatpush3.bf16.msra.mxu0 %v1235_v43  ;;  %v1159_v62 = vmul.f32 1.442695, %v1157_v61 }
 0x513   : > { %2533 = vmatprep.subr.bf16.mxu0 %v3046_v8  ;;  %2744 = vpow2.f32 %v1165_v42  ;;  %v1164_v45 = vsub.f32 %v1148_v35, %v1156_v44  ;;  %v1158_v63 = vsub.f32 -1e+30, %v1156_v44 }
 0x514   : > { %v1182_v46 = vpop.permute.xlu0 %1181  ;;  %v1286_v50 = vpop.permute.xlu1 %1285 }
 0x515   : > { %v1187_v47 = vsel %vm947_vm6, %v1182_v46, 0  ;;  %v1167_v48 = vmul.f32 1.442695, %v1164_v45  ;;  %v1291_v52 = vsel %vm810_vm5, %v1286_v50, 0  ;;  %v1161_v0 = vmul.f32 1.442695, %v1158_v63 }
 0x516   : > { %2516 = vmatpush3.bf16.msra.mxu1 %v1187_v47 }
 0x517   : > { %2527 = vmatprep.subr.bf16.mxu1 %v3046_v8  ;;  %2746 = vpow2.f32 %v1167_v48 }
 0x518   : > { %v1336_v55 = vpop.permute.xlu0 %1335  ;;  %v1284_v59 = vpop.permute.xlu1 %1283  ;;  %2748 = vpow2.f32 %v1159_v62 }
 0x519   : > { %v1341_v57 = vsel %vm810_vm5, %v1336_v55, 0  ;;  %2750 = vpow2.f32 %v1161_v0 }
 0x51c   : > { %v1334_v60 = vpop.permute.xlu0 %1333 }
 0x51d   : > { %v3525_v49 = vpop.eup %2744 }
 0x51e   : > { %v1179_v51 = vpack.c.bf16 %v3525_v49, %v3525_v49 }
 0x520   : > { %2518 = vmatmul.mubr.msk.bf16.vlgmr.msra.gmra.mrb[12].mxu1 %vm810_vm5, %v1179_v51 }
 0x521   : > { %2528 = vmatpush3.bf16.xpose.msra.mxu1 %v1291_v52  ;;  %2529 = vmatprep.mubr.msk.bf16.mxu1 %vm3047_vm3, %v3046_v8  ;;  %v3533_v53 = vpop.eup %2746 }
 0x522   : > { %2539 = vmatprep.subr.bf16.mxu1 %v3046_v8  ;;  %v1180_v56 = vpack.c.bf16 %v3533_v53, %v3533_v53  ;;  %v2749_v1 = vpop.eup %2748 }
 0x523   : > { %v3549_v2 = vmul.f32 0.0, %v2749_v1  ;;  %v2751_v5 = vpop.eup %2750 }
 0x524   : > { %2524 = vmatmul.mubr.msk.bf16.vlgmr.msra.gmra.mrb[16].mxu0 %vm810_vm5, %v1180_v56  ;;  %v3554_v15 = vmul.f32 0.0, %v2751_v5 }
 0x525   : > { %2534 = vmatpush3.bf16.xpose.msra.mxu0 %v1341_v57  ;;  %2535 = vmatprep.mubr.msk.bf16.mxu0 %vm3047_vm3, %v3046_v8 }
 0x526   : > { %2545 = vmatprep.subr.bf16.mxu0 %v3046_v8 }
 0x528   : > { %2530 = vmatmul.mubr.msk.bf16.vlgmr.msra.gmra.mrb[16].mxu1 %vm810_vm5, %v1284_v59 }
 0x529   : > { %2541 = vmatprep.mubr.msk.bf16.mxu1 %vm3047_vm3, %v3046_v8 }
 0x52c   : > { %2536 = vmatmul.mubr.msk.bf16.vlgmr.msra.gmra.mrb[20].mxu0 %vm810_vm5, %v1334_v60 }
 0x52d   : > { %2547 = vmatprep.mubr.msk.bf16.mxu0 %vm3047_vm3, %v3046_v8 }
 0x5f3   : > { %v1223_v3 = vpop.f32.mrb[12].mxu1 }
 0x5f4   : > { %v3552_v6 = vadd.f32 %v1223_v3, %v3549_v2  ;;  %v2519_v9 = vpop.f32.mrb[13].mxu1 }
 0x5f5   : > { %v1226_v12 = vpop.f32.mrb[14].mxu1 }
 0x5f6   : > { %v2520_v13 = vpop.f32.mrb[15].mxu1 }
 0x5f7   : > { %v1271_v17 = vpop.f32.mrb[16].mxu0 }
 0x5f8   : > { %v3557_v19 = vadd.f32 %v1271_v17, %v3554_v15  ;;  %v2525_v20 = vpop.f32.mrb[17].mxu0 }
 0x5f9   : > { %v1274_v22 = vpop.f32.mrb[18].mxu0 }
 0x5fa   : > { %v2526_v23 = vpop.f32.mrb[19].mxu0 }
 0x5fb   : > { %v1327_v24 = vpop.f32.mrb[16].mxu1 }
 0x5fc   : > { %v1383_v25 = vmul.f32 0.35355338, %v1327_v24  ;;  %v2531_v26 = vpop.f32.mrb[17].mxu1 }
 0x5fd   : > { %v1330_v27 = vpop.f32.mrb[18].mxu1 }
 0x5fe   : > { %v2532_v28 = vpop.f32.mrb[19].mxu1  ;;  %v1385_v30 = vadd.f32 %v1383_v25, %v3467_v29 }
 0x5ff   : > { %v1377_v31 = vpop.f32.mrb[20].mxu0 }
 0x600   : > { %v1387_v32 = vsel %vm810_vm5, %v1385_v30, -inf  ;;  %v1384_v33 = vmul.f32 0.35355338, %v1377_v31  ;;  %v2537_v34 = vpop.f32.mrb[21].mxu0 }
 0x601   : > { %1388 = vmax.xlane.f32.xlu1 %v1387_v32  ;;  %v1380_v35 = vpop.f32.mrb[22].mxu0 }
 0x602   : > { %v2538_v36 = vpop.f32.mrb[23].mxu0  ;;  %v1386_v37 = vadd.f32 %v1384_v33, %v3467_v29 }
 0x604   : > { %v1390_v38 = vsel %vm810_vm5, %v1386_v37, -inf }
 0x605   : > { %1391 = vmax.xlane.f32.xlu0 %v1390_v38 }
 0x612   : > { %1467 = vrot.lane.b32.xlu1 %v3444_v21, %s3055_s21 }
 0x616   : > { %1523 = vrot.lane.b32.xlu1 %v3441_v18, %s3056_s16 }
 0x61a   : > { %1521 = vrot.lane.b32.xlu1 %v3441_v18, %s3057_s12 }
 0x61b   : > { %1419 = vrot.lane.b32.xlu0 %v3441_v18, %s3055_s21 }
 0x61f   : > { %1573 = vrot.lane.b32.xlu0 %v3444_v21, %s3056_s16 }
 0x623   : > { %1571 = vrot.lane.b32.xlu0 %v3444_v21, %s3057_s12 }
 0x68e   : > { %v1389_v39 = vpop.xlane.xlu1 %1388 }
 0x68f   : > { %v1393_v40 = vmax.f32 %v1389_v39, -1e+30 }
 0x691   : > { %v1401_v41 = vsub.f32 %v1385_v30, %v1393_v40  ;;  %v1395_v1 = vsub.f32 -1e+30, %v1393_v40 }
 0x692   : > { %v1468_v42 = vpop.permute.xlu1 %1467  ;;  %v1392_v45 = vpop.xlane.xlu0 %1391 }
 0x693   : > { %v1403_v43 = vmul.f32 1.442695, %v1401_v41  ;;  %v1473_v44 = vsel %vm947_vm6, %v1468_v42, 0  ;;  %v1394_v46 = vmax.f32 %v1392_v45, -1e+30 }
 0x694   : > { %2546 = vmatpush3.bf16.msra.mxu0 %v1473_v44  ;;  %v1397_v3 = vmul.f32 1.442695, %v1395_v1 }
 0x695   : > { %2557 = vmatprep.subr.bf16.mxu0 %v3046_v8  ;;  %2752 = vpow2.f32 %v1403_v43  ;;  %v1402_v47 = vsub.f32 %v1386_v37, %v1394_v46  ;;  %v1396_v5 = vsub.f32 -1e+30, %v1394_v46 }
 0x696   : > { %v1420_v48 = vpop.permute.xlu0 %1419  ;;  %v1524_v55 = vpop.permute.xlu1 %1523 }
 0x697   : > { %v1405_v50 = vmul.f32 1.442695, %v1402_v47  ;;  %v1425_v51 = vsel %vm947_vm6, %v1420_v48, 0  ;;  %v1529_v57 = vsel %vm810_vm5, %v1524_v55, 0  ;;  %v1399_v9 = vmul.f32 1.442695, %v1396_v5 }
 0x698   : > { %2540 = vmatpush3.bf16.msra.mxu1 %v1425_v51  ;;  %v1171_v47 = vsel %vm810_vm5, %v3525_v49, 0.0 }
 0x699   : > { %2551 = vmatprep.subr.bf16.mxu1 %v3046_v8  ;;  %2754 = vpow2.f32 %v1405_v50  ;;  %v1174_v50 = vsel %vm810_vm5, %v3533_v53, 0.0 }
 0x69a   : > { %v1574_v60 = vpop.permute.xlu0 %1573  ;;  %v1522_v63 = vpop.permute.xlu1 %1521  ;;  %2756 = vpow2.f32 %v1397_v3  ;;  %v932_v3 = vsel %vm810_vm5, %v3477_v54, 0.0 }
 0x69b   : > { %v1579_v62 = vsel %vm810_vm5, %v1574_v60, 0  ;;  %2758 = vpow2.f32 %v1399_v9 }
 0x69e   : > { %v1572_v0 = vpop.permute.xlu0 %1571 }
 0x69f   : > { %v3573_v52 = vpop.eup %2752 }
 0x6a0   : > { %v1417_v56 = vpack.c.bf16 %v3573_v52, %v3573_v52 }
 0x6a2   : > { %2542 = vmatmul.mubr.msk.bf16.vlgmr.msra.gmra.mrb[20].mxu1 %vm810_vm5, %v1417_v56 }
 0x6a3   : > { %2552 = vmatpush3.bf16.xpose.msra.mxu1 %v1529_v57  ;;  %2553 = vmatprep.mubr.msk.bf16.mxu1 %vm3047_vm3, %v3046_v8  ;;  %v2755_v59 = vpop.eup %2754 }
 0x6a4   : > { %2563 = vmatprep.subr.bf16.mxu1 %v3046_v8  ;;  %v1418_v61 = vpack.c.bf16 %v2755_v59, %v2755_v59  ;;  %v2757_v12 = vpop.eup %2756  ;;  %v1412_v48 = vsel %vm810_vm5, %v2755_v59, 0.0 }
 0x6a5   : > { %v3593_v13 = vmul.f32 0.0, %v2757_v12  ;;  %v2759_v20 = vpop.eup %2758  ;;  %v935_v12 = vsel %vm810_vm5, %v3483_v58, 0.0 }
 0x6a6   : > { %2548 = vmatmul.mubr.msk.bf16.vlgmr.msra.gmra.mrb[24].mxu0 %vm810_vm5, %v1418_v61  ;;  %v3598_v26 = vmul.f32 0.0, %v2759_v20 }
 0x6a7   : > { %2558 = vmatpush3.bf16.xpose.msra.mxu0 %v1579_v62  ;;  %2559 = vmatprep.mubr.msk.bf16.mxu0 %vm3047_vm3, %v3046_v8 }
 0x6a8   : > { %2569 = vmatprep.subr.bf16.mxu0 %v3046_v8 }
 0x6aa   : > { %2554 = vmatmul.mubr.msk.bf16.vlgmr.msra.gmra.mrb[24].mxu1 %vm810_vm5, %v1522_v63 }
 0x6ab   : > { %2565 = vmatprep.mubr.msk.bf16.mxu1 %vm3047_vm3, %v3046_v8 }
 0x6ae   : > { %2560 = vmatmul.mubr.msk.bf16.vlgmr.msra.gmra.mrb[28].mxu0 %vm810_vm5, %v1572_v0 }
 0x6af   : > { %2571 = vmatprep.mubr.msk.bf16.mxu0 %vm3047_vm3, %v3046_v8 }
 0x775   : > { %v1461_v17 = vpop.f32.mrb[20].mxu1 }
 0x776   : > { %v3596_v22 = vadd.f32 %v1461_v17, %v3593_v13  ;;  %v2543_v23 = vpop.f32.mrb[21].mxu1 }
 0x777   : > { %v1464_v24 = vpop.f32.mrb[22].mxu1 }
 0x778   : > { %v2544_v25 = vpop.f32.mrb[23].mxu1 }
 0x779   : > { %v1509_v27 = vpop.f32.mrb[24].mxu0 }
 0x77a   : > { %v3601_v28 = vadd.f32 %v1509_v27, %v3598_v26  ;;  %v2549_v30 = vpop.f32.mrb[25].mxu0 }
 0x77b   : > { %v1512_v31 = vpop.f32.mrb[26].mxu0 }
 0x77c   : > { %v2550_v32 = vpop.f32.mrb[27].mxu0 }
 0x77d   : > { %v1565_v33 = vpop.f32.mrb[24].mxu1 }
 0x77e   : > { %v1621_v34 = vmul.f32 0.35355338, %v1565_v33  ;;  %v2555_v35 = vpop.f32.mrb[25].mxu1 }
 0x77f   : > { %v1568_v36 = vpop.f32.mrb[26].mxu1 }
 0x780   : > { %v2556_v37 = vpop.f32.mrb[27].mxu1  ;;  %v1623_v38 = vadd.f32 %v1621_v34, %v3467_v29 }
 0x781   : > { %v1615_v39 = vpop.f32.mrb[28].mxu0 }
 0x782   : > { %v1625_v40 = vsel %vm810_vm5, %v1623_v38, -inf  ;;  %v1622_v41 = vmul.f32 0.35355338, %v1615_v39  ;;  %v2561_v42 = vpop.f32.mrb[29].mxu0 }
 0x783   : > { %1626 = vmax.xlane.f32.xlu1 %v1625_v40  ;;  %v1618_v43 = vpop.f32.mrb[30].mxu0 }
 0x784   : > { %v2562_v44 = vpop.f32.mrb[31].mxu0  ;;  %v1624_v45 = vadd.f32 %v1622_v41, %v3467_v29  ;;  %v1409_v29 = vsel %vm810_vm5, %v3573_v52, 0.0 }
 0x786   : > { %v1628_v46 = vsel %vm810_vm5, %v1624_v45, -inf }
 0x787   : > { %1629 = vmax.xlane.f32.xlu0 %v1628_v46 }
 0x794   : > { %1705 = vrot.lane.b32.xlu1 %v3444_v21, %s3058_s20 }
 0x79d   : > { %1657 = vrot.lane.b32.xlu0 %v3441_v18, %s3058_s20 }
 0x7b8   : > { %1172 = vadd.xlane.f32.xlu1 %v1171_v47 }
 0x7bc   : > { %1413 = vadd.xlane.f32.xlu1 %v1412_v48  ;;  %1175 = vadd.xlane.f32.xlu0 %v1174_v50 }
 0x7c0   : > { %1410 = vadd.xlane.f32.xlu0 %v1409_v29  ;;  %v2729_v29 = vld [vmem:[%s3392_s24 + $0x8] sm:$0xff]  }
 0x810   : > { %v3616_v51 = vpop.xlane.xlu1 %1626 }
 0x811   : > { %v1631_v21 = vmax.f32 %v3616_v51, -1e+30 }
 0x813   : > { %v1639_v18 = vsub.f32 %v1623_v38, %v1631_v21  ;;  %v1633_v43 = vsub.f32 -1e+30, %v1631_v21 }
 0x814   : > { %v1706_v49 = vpop.permute.xlu1 %1705  ;;  %v3622_v57 = vpop.xlane.xlu0 %1629 }
 0x815   : > { %v1641_v55 = vmul.f32 1.442695, %v1639_v18  ;;  %v1711_v56 = vsel %vm947_vm6, %v1706_v49, 0  ;;  %v1632_v53 = vmax.f32 %v3622_v57, -1e+30 }
 0x816   : > { %2570 = vmatpush3.bf16.msra.mxu0 %v1711_v56  ;;  %v1635_v44 = vmul.f32 1.442695, %v1633_v43 }
 0x817   : > { %2583 = vmatprep.subr.bf16.mxu0 %v3046_v8  ;;  %2760 = vpow2.f32 %v1641_v55  ;;  %v1640_v52 = vsub.f32 %v1624_v45, %v1632_v53  ;;  %v1634_v45 = vsub.f32 -1e+30, %v1632_v53 }
 0x818   : > { %v1658_v59 = vpop.permute.xlu0 %1657 }
 0x819   : > { %v1643_v60 = vmul.f32 1.442695, %v1640_v52  ;;  %v1663_v61 = vsel %vm947_vm6, %v1658_v59, 0 }
 0x81a   : > { %2564 = vmatpush3.bf16.msra.mxu1 %v1663_v61 }
 0x81b   : > { %2575 = vmatprep.subr.bf16.mxu1 %v3046_v8  ;;  %2762 = vpow2.f32 %v1643_v60 }
 0x821   : > { %v2761_v62 = vpop.eup %2760 }
 0x822   : > { %v1647_v63 = vsel %vm810_vm5, %v2761_v62, 0.0  ;;  %v1655_v0 = vpack.c.bf16 %v2761_v62, %v2761_v62 }
 0x823   : > { %1648 = vadd.xlane.f32.xlu0 %v1647_v63 }
 0x824   : > { %2566 = vmatmul.mubr.msk.bf16.vlgmr.msra.gmra.mrb[28].mxu1 %vm810_vm5, %v1655_v0 }
 0x825   : > { %2579 = vmatprep.mubr.msk.bf16.mxu1 %vm3047_vm3, %v3046_v8  ;;  %v2763_v1 = vpop.eup %2762 }
 0x826   : > { %v1650_v5 = vsel %vm810_vm5, %v2763_v1, 0.0  ;;  %v1656_v9 = vpack.c.bf16 %v2763_v1, %v2763_v1 }
 0x827   : > { %933 = vadd.xlane.f32.xlu0 %v932_v3  ;;  %1651 = vadd.xlane.f32.xlu1 %v1650_v5 }
 0x828   : > { %2572 = vmatmul.mubr.msk.bf16.vlgmr.msra.gmra.mrb[32].mxu0 %vm810_vm5, %v1656_v9 }
 0x829   : > { %2587 = vmatprep.mubr.msk.bf16.mxu0 %vm3047_vm3, %v3046_v8 }
 0x82b   : > { %936 = vadd.xlane.f32.xlu1 %v935_v12 }
 0x845   : > { %v1173_v17 = vpop.xlane.xlu1 %1172 }
 0x846   : > { %v1177_v20 = vadd.f32 %v1173_v17, %v3549_v2 }
 0x848   : > { %2764 = vrcp.f32 %v1177_v20 }
 0x849   : > { %v1414_v23 = vpop.xlane.xlu1 %1413  ;;  %v1176_v24 = vpop.xlane.xlu0 %1175 }
 0x84a   : > { %v1416_v54 = vadd.f32 %v1414_v23, %v3598_v26  ;;  %v1178_v25 = vadd.f32 %v1176_v24, %v3554_v15 }
 0x84c   : > { %2766 = vrcp.f32 %v1416_v54 }
 0x84d   : > { %2768 = vrcp.f32 %v1178_v25  ;;  %v1411_v27 = vpop.xlane.xlu0 %1410 }
 0x84e   : > { %v1415_v30 = vadd.f32 %v1411_v27, %v3593_v13  ;;  %v2728_v13 = vld [vmem:[%s3392_s24] sm:$0xff]   ;;  %s3829_s24 = scalar_lea.vmem [#allocation7], %s3364_s10 }
 0x84f   : > { %2576 = vmatpush3.bf16.msra.mxu1 %v2728_v13 }
 0x850   : > { %2770 = vrcp.f32 %v1415_v30  ;;  %2577 = vmatprep.subr.bf16.mxu1 %v3046_v8 }
 0x852   : > { %v2765_v31 = vpop.eup %2764 }
 0x853   : > { %v1281_v58 = vmul.f32 %v2765_v31, %v3552_v6  ;;  %2578 = vmatpush3.bf16.msra.mxu1 %v2729_v29  ;;  %v2400_v29 = vld [vmem:[%s3830_s1] ss:$0 sm:$0xff] }
 0x854   : > { %2591 = vmatprep.subr.bf16.mxu1 %v3046_v8 }
 0x856   : > { %v2767_v32 = vpop.eup %2766 }
 0x857   : > { %v2769_v33 = vpop.eup %2768  ;;  %v1520_v2 = vmul.f32 %v2767_v32, %v3601_v28  ;;  %v2396_v32 = vld [vmem:[%s3829_s24] ss:$0 sm:$0xff] }
 0x858   : > { %v1282_v34 = vmul.f32 %v2769_v33, %v3557_v19 }
 0x85a   : > { %v2711_v26 = vpack.i.bf16 %v1282_v34, %v1281_v58  ;;  %v2771_v35 = vpop.eup %2770 }
 0x85b   : > { %v1519_v15 = vmul.f32 %v2771_v35, %v3596_v22 }
 0x85c   : > { %2712 = vrot.lane.b32.xlu0 %v2711_v26, %s3059_s27 }
 0x85d   : > { %v2716_v36 = vpack.i.bf16 %v1520_v2, %v1519_v15 }
 0x85f   : > { %2717 = vrot.lane.b32.xlu1 %v2716_v36, %s3060_s14 }
 0x8b0   : > { %v1649_v6 = vpop.xlane.xlu0 %1648 }
 0x8b4   : > { %v934_v37 = vpop.xlane.xlu0 %933  ;;  %v1652_v38 = vpop.xlane.xlu1 %1651 }
 0x8b5   : > { %v938_v28 = vadd.f32 %v934_v37, %v3501_v4  ;;  %v1637_v4 = vmul.f32 1.442695, %v1634_v45 }
 0x8b7   : > { %2772 = vrcp.f32 %v938_v28 }
 0x8b8   : > { %v937_v19 = vpop.xlane.xlu1 %936 }
 0x8b9   : > { %v939_v39 = vadd.f32 %v937_v19, %v3506_v14 }
 0x8bb   : > { %2774 = vrcp.f32 %v939_v39 }
 0x8bc   : > { %2776 = vpow2.f32 %v1635_v44  ;;  %v2731_v44 = vld [vmem:[%s3397_s25 + $0x8] sm:$0xff]  }
 0x8bd   : > { %2778 = vpow2.f32 %v1637_v4 }
 0x8c1   : > { %v2773_v40 = vpop.eup %2772 }
 0x8c2   : > { %v1043_v22 = vmul.f32 %v2773_v40, %v3504_v7 }
 0x8c5   : > { %v2775_v41 = vpop.eup %2774 }
 0x8c6   : > { %v1044_v42 = vmul.f32 %v2775_v41, %v3509_v16  ;;  %v2777_v46 = vpop.eup %2776 }
 0x8c7   : > { %v1645_v14 = vmul.f32 0.0, %v2777_v46  ;;  %v2779_v47 = vpop.eup %2778 }
 0x8c8   : > { %v1646_v50 = vmul.f32 0.0, %v2779_v47 }
 0x8c9   : > { %v1653_v48 = vadd.f32 %v1649_v6, %v1645_v14 }
 0x8ca   : > { %v1654_v7 = vadd.f32 %v1652_v38, %v1646_v50 }
 0x8cb   : > { %2780 = vrcp.f32 %v1653_v48 }
 0x8cc   : > { %2782 = vrcp.f32 %v1654_v7 }
 0x8ce   : > { %v2713_v0 = vpop.permute.xlu0 %2712 }
 0x8cf   : > { %v2715_v3 = vunpack.i.h.bf16 %v2713_v0  ;;  %v2714_v5 = vunpack.i.l.bf16 %v2713_v0 }
 0x8d1   : > { %v2718_v1 = vpop.permute.xlu1 %2717  ;;  %v1784_v20 = vsel %vm810_vm5, %v1044_v42, %v2715_v3  ;;  %v1783_v23 = vsel %vm810_vm5, %v1043_v22, %v2714_v5 }
 0x8d2   : > { %v2720_v9 = vunpack.i.h.bf16 %v2718_v1  ;;  %v2719_v12 = vunpack.i.l.bf16 %v2718_v1 }
 0x8d4   : > { %v1786_v25 = vsel %vm1785_vm7, %v1783_v23, %v2719_v12  ;;  %v1787_v27 = vsel %vm1785_vm7, %v1784_v20, %v2720_v9  ;;  %v2735_v23 = vld [vmem:[%s3403_s17 + $0x18] sm:$0xff]  }
 0x8d5   : > { %v2781_v21 = vpop.eup %2780 }
 0x8d6   : > { %v2783_v59 = vpop.eup %2782 }
 0x8f7   : > { %v1699_v16 = vpop.f32.mrb[28].mxu1 }
 0x8f8   : > { %v1753_v18 = vadd.f32 %v1699_v16, %v1645_v14  ;;  %v2567_v51 = vpop.f32.mrb[29].mxu1 }
 0x8f9   : > { %v1702_v49 = vpop.f32.mrb[30].mxu1 }
 0x8fa   : > { %v1757_v55 = vmul.f32 %v2781_v21, %v1753_v18  ;;  %v2568_v56 = vpop.f32.mrb[31].mxu1 }
 0x8fb   : > { %v1747_v57 = vpop.f32.mrb[32].mxu0 }
 0x8fc   : > { %v1754_v53 = vadd.f32 %v1747_v57, %v1646_v50  ;;  %v2573_v52 = vpop.f32.mrb[33].mxu0 }
 0x8fd   : > { %v1750_v60 = vpop.f32.mrb[34].mxu0  ;;  %v2733_v52 = vld [vmem:[%s3403_s17 + $0x8] sm:$0xff]  }
 0x8fe   : > { %v1758_v61 = vmul.f32 %v2783_v59, %v1754_v53  ;;  %v2574_v62 = vpop.f32.mrb[35].mxu0  ;;  %v2732_v53 = vld [vmem:[%s3403_s17] sm:$0xff]   ;;  %v2734_v59 = vld [vmem:[%s3403_s17 + $0x10] sm:$0xff]  }
 0x8ff   : > { %v2402_v60 = vld [vmem:[%s600_s6] ss:$0 sm:$0xff] }
 0x900   : > { %v2721_v63 = vpack.i.bf16 %v1758_v61, %v1757_v55 }
 0x902   : > { %2722 = vrot.lane.b32.xlu1 %v2721_v63, %s3061_s0 }
 0x974   : > { %v2723_v17 = vpop.permute.xlu1 %2722 }
 0x975   : > { %v2725_v54 = vunpack.i.h.bf16 %v2723_v17  ;;  %v2724_v24 = vunpack.i.l.bf16 %v2723_v17 }
 0x977   : > { %v1790_v30 = vsel %vm1788_vm8, %v1787_v27, %v2725_v54  ;;  %v1789_v31 = vsel %vm1788_vm8, %v1786_v25, %v2724_v24 }
 0x978   : > { %v1791_v58 = vpack.c.bf16 %v1790_v30, %v1789_v31 }
 0x97a   : > { %2580 = vmatmul.mubr.msk.bf16.vlgmr.msra.gmra.mrb[32].mxu1 %vm759_vm4, %v1791_v58 }
 0x97b   : > { %2599 = vmatprep.mubr.msk.bf16.mxu1 %vm3047_vm3, %v3046_v8  ;;  %2592 = vmatpush3.bf16.msra.mxu1 %v2732_v53 }
 0x97c   : > { %2593 = vmatprep.subr.bf16.mxu1 %v3046_v8 }
 0x97f   : > { %2594 = vmatpush3.bf16.msra.mxu1 %v2733_v52 }
 0x980   : > { %2595 = vmatprep.subr.bf16.mxu1 %v3046_v8 }
 0x983   : > { %2596 = vmatpush3.bf16.msra.mxu1 %v2734_v59 }
 0x984   : > { %2597 = vmatprep.subr.bf16.mxu1 %v3046_v8 }
 0x987   : > { %2598 = vmatpush3.bf16.msra.mxu1 %v2735_v23 }
 0xa4d   : > { %v1852_v33 = vpop.f32.mrb[32].mxu1 }
 0xa4e   : > { %v1853_v2 = vadd.f32 %v2396_v32, %v1852_v33  ;;  %v2581_v34 = vpop.f32.mrb[33].mxu1 }
 0xa4f   : > { %v1855_v26 = vpop.f32.mrb[34].mxu1 }
 0xa50   : > { %v1856_v35 = vadd.f32 %v2396_v32, %v1855_v26  ;;  %v2582_v15 = vpop.f32.mrb[35].mxu1  ;;  %v1859_v36 = vadd.f32 %v1853_v2, %v3423_v10  ;;  %v2408_v32 = vld [vmem:[%s707_s11] ss:$0 sm:$0xff] }
 0xa52   : > { %v1863_v13 = vsel %vm759_vm4, %v1859_v36, 0.0  ;;  %v1860_v6 = vadd.f32 %v1856_v35, %v3425_v11  ;;  %v2730_v11 = vld [vmem:[%s3397_s25] sm:$0xff]   ;;  %s3831_s25 = scalar_lea.vmem [#allocation10], %s3364_s10 }
 0xa53   : > { %1864 = vadd.xlane.f32.xlu0 %v1863_v13  ;;  %2584 = vmatpush3.bf16.msra.mxu0 %v2730_v11  ;;  %v2401_v21 = vld [vmem:[%s3831_s25] ss:$0 sm:$0xff] }
 0xa54   : > { %v1866_v37 = vsel %vm759_vm4, %v1860_v6, 0.0  ;;  %2585 = vmatprep.subr.bf16.mxu0 %v3046_v8 }
 0xa55   : > { %1867 = vadd.xlane.f32.xlu1 %v1866_v37 }
 0xa57   : > { %2586 = vmatpush3.bf16.msra.mxu0 %v2731_v44 }
 0xae0   : > { %v1865_v38 = vpop.xlane.xlu0 %1864 }
 0xae1   : > { %v1870_v28 = vmul.f32 0.03125, %v1865_v38 }
 0xae2   : > { %v1868_v19 = vpop.xlane.xlu1 %1867 }
 0xae3   : > { %v1872_v39 = vsub.f32 %v1859_v36, %v1870_v28  ;;  %v1871_v40 = vmul.f32 0.03125, %v1868_v19 }
 0xae5   : > { %v1873_v22 = vsub.f32 %v1860_v6, %v1871_v40  ;;  %v1874_v41 = vmul.f32 %v1872_v39, %v1872_v39 }
 0xae7   : > { %v1876_v42 = vsel %vm759_vm4, %v1874_v41, 0.0  ;;  %v1875_v10 = vmul.f32 %v1873_v22, %v1873_v22 }
 0xae8   : > { %1877 = vadd.xlane.f32.xlu0 %v1876_v42 }
 0xae9   : > { %v1879_v43 = vsel %vm759_vm4, %v1875_v10, 0.0 }
 0xaec   : > { %1880 = vadd.xlane.f32.xlu0 %v1879_v43 }
 0xb75   : > { %v1878_v45 = vpop.xlane.xlu0 %1877 }
 0xb76   : > { %v1882_v4 = vmul.f32 0.03125, %v1878_v45 }
 0xb78   : > { %v1884_v46 = vadd.f32 1e-05, %v1882_v4 }
 0xb79   : > { %v1881_v14 = vpop.xlane.xlu0 %1880 }
 0xb7a   : > { %2784 = vrsqrt.f32 %v1884_v46  ;;  %v1883_v47 = vmul.f32 0.03125, %v1881_v14 }
 0xb7c   : > { %v1885_v48 = vadd.f32 1e-05, %v1883_v47 }
 0xb7e   : > { %2786 = vrsqrt.f32 %v1885_v48  ;;  %v2414_v48 = vld [vmem:[%s710_s29] ss:$0 sm:$0xff] }
 0xb84   : > { %v2785_v50 = vpop.eup %2784 }
 0xb85   : > { %v1888_v7 = vmul.f32 %v2785_v50, %v1872_v39 }
 0xb87   : > { %v1896_v18 = vmul.f32 %v2400_v29, %v1888_v7 }
 0xb88   : > { %v2787_v16 = vpop.eup %2786 }
 0xb89   : > { %v1889_v51 = vmul.f32 %v2787_v16, %v1873_v22  ;;  %v1904_v55 = vadd.f32 %v2401_v21, %v1896_v18 }
 0xb8b   : > { %v1897_v49 = vmul.f32 %v2400_v29, %v1889_v51  ;;  %v2415_v29 = vld [vmem:[%s713_s18] ss:$0 sm:$0xff] }
 0xb8d   : > { %v1905_v56 = vadd.f32 %v2401_v21, %v1897_v49 }
 0xb8f   : > { %v1906_v57 = vpack.c.bf16 %v1905_v56, %v1904_v55 }
 0xb91   : > { %2588 = vmatmul.mubr.msk.bf16.vlgmr.msra.gmra.mrb[36].mxu0 %vm759_vm4, %v1906_v57 }
 0xc64   : > { %v1967_v61 = vpop.f32.mrb[36].mxu0 }
 0xc65   : > { %v1968_v62 = vadd.f32 %v2402_v60, %v1967_v61  ;;  %v2589_v63 = vpop.f32.mrb[37].mxu0 }
 0xc66   : > { %v1970_v0 = vpop.f32.mrb[38].mxu0 }
 0xc67   : > { %v2406_v1 = vmul.f32 -1.442695, %v1968_v62  ;;  %v1971_v3 = vadd.f32 %v2402_v60, %v1970_v0  ;;  %v2590_v5 = vpop.f32.mrb[39].mxu0 }
 0xc69   : > { %2788 = vpow2.f32 %v2406_v1  ;;  %v2407_v9 = vmul.f32 -1.442695, %v1971_v3 }
 0xc6b   : > { %2790 = vpow2.f32 %v2407_v9 }
 0xc73   : > { %v2789_v12 = vpop.eup %2788 }
 0xc74   : > { %v1980_v17 = vadd.f32 1.0, %v2789_v12 }
 0xc75   : > { %v2791_v20 = vpop.eup %2790 }
 0xc76   : > { %2792 = vrcp.f32 %v1980_v17  ;;  %v1981_v54 = vadd.f32 1.0, %v2791_v20 }
 0xc78   : > { %2794 = vrcp.f32 %v1981_v54 }
 0xc80   : > { %v2793_v8 = vpop.eup %2792 }
 0xc81   : > { %1988 = vrot.lane.b32.xlu1 %v2793_v8, %s3049_s13 }
 0xc82   : > { %v2795_v24 = vpop.eup %2794 }
 0xc83   : > { %1990 = vrot.lane.b32.xlu0 %v2795_v24, %s3049_s13 }
 0xcf3   : > { %v1989_v25 = vpop.permute.xlu1 %1988 }
 0xcf4   : > { %v1994_v30 = vmul.f32 %v1989_v25, %v1968_v62 }
 0xcf5   : > { %v1991_v27 = vpop.permute.xlu0 %1990 }
 0xcf6   : > { %v1995_v31 = vmul.f32 %v1991_v27, %v1971_v3 }
 0xcf8   : > { %v1996_v58 = vpack.c.bf16 %v1995_v31, %v1994_v30 }
 0xcfa   : > { %2600 = vmatmul.mubr.msk.bf16.vlgmr.msra.gmra.mrb[36].mxu1 %vm2036_vm9, %v1996_v58 }
 0xdcd   : > { %v2074_v33 = vpop.f32.mrb[36].mxu1 }
 0xdce   : > { %v2075_v2 = vadd.f32 %v2408_v32, %v2074_v33  ;;  %v2601_v34 = vpop.f32.mrb[37].mxu1 }
 0xdcf   : > { %v2077_v26 = vpop.f32.mrb[38].mxu1 }
 0xdd0   : > { %v2078_v35 = vadd.f32 %v2408_v32, %v2077_v26  ;;  %v2602_v15 = vpop.f32.mrb[39].mxu1  ;;  %v2081_v36 = vadd.f32 %v2075_v2, %v1904_v55 }
 0xdd2   : > { %v2085_v13 = vsel %vm759_vm4, %v2081_v36, 0.0  ;;  %v2082_v6 = vadd.f32 %v2078_v35, %v1905_v56 }
 0xdd3   : > { %2086 = vadd.xlane.f32.xlu1 %v2085_v13 }
 0xdd4   : > { %v2088_v37 = vsel %vm759_vm4, %v2082_v6, 0.0 }
 0xdd5   : > { %2089 = vadd.xlane.f32.xlu0 %v2088_v37 }
 0xe60   : > { %v2087_v38 = vpop.xlane.xlu1 %2086 }
 0xe61   : > { %v2091_v28 = vmul.f32 0.03125, %v2087_v38 }
 0xe62   : > { %v2090_v19 = vpop.xlane.xlu0 %2089 }
 0xe63   : > { %v2093_v39 = vsub.f32 %v2081_v36, %v2091_v28  ;;  %v2092_v40 = vmul.f32 0.03125, %v2090_v19 }
 0xe65   : > { %v2094_v22 = vsub.f32 %v2082_v6, %v2092_v40  ;;  %v2095_v41 = vmul.f32 %v2093_v39, %v2093_v39 }
 0xe67   : > { %v2097_v42 = vsel %vm759_vm4, %v2095_v41, 0.0  ;;  %v2096_v10 = vmul.f32 %v2094_v22, %v2094_v22 }
 0xe68   : > { %2098 = vadd.xlane.f32.xlu1 %v2097_v42 }
 0xe69   : > { %v2100_v43 = vsel %vm759_vm4, %v2096_v10, 0.0 }
 0xe6a   : > { %2101 = vadd.xlane.f32.xlu0 %v2100_v43 }
 0xef5   : > { %v2099_v11 = vpop.xlane.xlu1 %2098 }
 0xef6   : > { %v2103_v44 = vmul.f32 0.03125, %v2099_v11 }
 0xef7   : > { %v2102_v45 = vpop.xlane.xlu0 %2101 }
 0xef8   : > { %v2105_v4 = vadd.f32 1e-05, %v2103_v44  ;;  %v2104_v46 = vmul.f32 0.03125, %v2102_v45 }
 0xefa   : > { %2796 = vrsqrt.f32 %v2105_v4  ;;  %v2106_v14 = vadd.f32 1e-05, %v2104_v46 }
 0xefc   : > { %2798 = vrsqrt.f32 %v2106_v14 }
 0xf04   : > { %v2797_v47 = vpop.eup %2796 }
 0xf05   : > { %v2109_v50 = vmul.f32 %v2797_v47, %v2093_v39 }
 0xf06   : > { %v2799_v7 = vpop.eup %2798 }
 0xf07   : > { %v2117_v16 = vmul.f32 %v2414_v48, %v2109_v50  ;;  %v2110_v18 = vmul.f32 %v2799_v7, %v2094_v22  ;;  %2132 = sbr.rel (%p2416_p9) target bundleno = 3854 (0xf0e), region = 100 }
 0xf09   : > { %v2125_v51 = vadd.f32 %v2415_v29, %v2117_v16  ;;  %v2118_v21 = vmul.f32 %v2414_v48, %v2110_v18 }
 0xf0b   : > { %2127 = vst.msk [vmem:[#allocation2] sm:$0xff] %vm759_vm4, %v2125_v51  ;;  %v2126_v49 = vadd.f32 %v2415_v29, %v2118_v21  ;;  %2133 = vst.msk [vmem:[#allocation13] sm:$0xff] (!%p2416_p9), %vm759_vm4, %v2125_v51 }
 0xf0d   : > { %2128 = vst.msk [vmem:[#allocation2 + $0x8] sm:$0xff] %vm759_vm4, %v2126_v49  ;;  %2134 = vst.msk [vmem:[#allocation13 + $0x8] sm:$0xff] (!%p2416_p9), %vm759_vm4, %v2126_v49 }
 0xf0e PF: > { %p2639_p12 = scmp.eq.s32.totalorder %s3259_s4, 1  ;;  %s3062_s30 = smov [#allocation13]  }
 0xf0f   : > { %s2144_s29 = sshll.u32 %s3062_s30, 4  ;;  %s2145_s29 = int_to_ptr.vmem [resolvable:$true] %s2144_s29 }
 0xf10   : > { %s2948_s18 = scalar_lea.vmem %s2145_s29, 256  ;;  %p2955_p6 = scmp.lt.s32.totalorder %s2145_s29, %s2145_s29 }
 0xf11   : > { %p2949_p13 = scmp.ne.s32.totalorder %s2145_s29, %s2948_s18  ;;  %p2956_p0 = scmp.lt.s32.totalorder %s2948_s18, %s2948_s18 }
 0xf13   : > { %p2950_p8 = pnand %p2949_p13, %p2639_p12  ;;  %p2957_p1 = por %p2956_p0, %p2955_p6 }
 0xf15   : > { %p2951_p2 = pneg %p2950_p8 }
 0xf17   : > { %p2958_p7 = pnand %p2957_p1, %p2951_p2 }
 0xf19   : > { %2961 = shalt.err (!%p2958_p7)
}
 0xf1a   : > { %s3835_s19 = sld [smem:[#allocation33_spill]] }
 0xf20   : > { %s2962_s22 = scalar_lea.hbm %s3835_s19, 256 }
 0xf21   : > { %p2963_p10 = scmp.ne.s32.totalorder %s3835_s19, %s2962_s22  ;;  %p2968_p3 = scmp.lt.u32.totalorder %s2962_s22, %s3835_s19 }
 0xf23   : > { %p2964_p11 = pnand %p2963_p10, %p2639_p12 }
 0xf25   : > { %p2965_p5 = pneg %p2964_p11 }
 0xf27   : > { %p2970_p4 = pnand %p2968_p3, %p2965_p5 }
 0xf29   : > { %2973 = shalt.err (!%p2970_p4)
}
 0xf2a   : > { %s3063_s14 = smov 128  }
 0xf2b   : > { %2616 = dma.vmem_to_hbm [thread:$0]  (%p2639_p12), %s2145_s29, 256, %s3835_s19, [#allocation6], %s3063_s14, %s3063_s14, %s3059_s27  }
 0xf2c   : > { %3011 = dma.done.wait (%p2639_p12), [#allocation6], 256  }
 0xf2d   : > { %3013 = vsyncadd (%p2639_p12), [#allocation6], 4294967040 }
 0xf2e PF: > { %s3836_s1 = sld [smem:[#allocation20_spill]]  ;;  %s3837_s10 = sld [smem:[#allocation18_spill]] }
 0xf2f   : > { %s3838_s27 = sld [smem:[#allocation22_spill]]  ;;  %s3839_s28 = sld [smem:[#allocation19_spill]] }
 0xf30   : > { %s3840_s29 = sld [smem:[#allocation21_spill]]  ;;  %s3841_s25 = smov %s3020_s26 }
 0xf34   : > { %s31_s30 = sadd.s32 1, %s3836_s1   ;;  %s3842_s26 = smov %s3837_s10 }
 0xf35   : > { %p28_p9 = scmp.ge.s32.totalorder %s31_s30, 4  }
 0xf37   :  { %30 = sbr.rel (!%p28_p9) target bundleno = 20 (0x14), region = 183 }
 0xf3e   :  { %2160 = vsyncpa [#allocation5], 1 }
 0xf3f   :  { %2162 = vsyncpa [#allocation5 + $0x1], 1 }
 0xf40   :  { %2163 = vsyncpa [#allocation8], 1 }
 0xf41   :  { %2165 = vsyncpa [#allocation8 + $0x1], 1 }
 0xf42   :  { %2166 = vsyncpa [#allocation11], 1 }
 0xf43   :  { %2168 = vsyncpa [#allocation11 + $0x1], 1 }
 0xf44   :  { %2169 = vsyncpa [#allocation6], 1 }
 0xf45   :  { %2171 = vsyncpa [#allocation6 + $0x1], 1 }

</bundles_post_ra>
